<compile_context>
chip_gen: v6e
topology: v6e:2x2x1
jax: 0.10.0
libtpu: 0.0.40
codegen_flags: <defaults>
</compile_context>

<pallas_src>
import math
from functools import partial

import jax
import jax.numpy as jnp
from jax.experimental import pallas as pl
from jax.experimental.pallas import tpu as pltpu

D_MODEL = 32
N_HEADS = 4
SEQ_LEN = 8
BATCH = 2
D_FF = 256 * 4          # fixed by the module: PoswiseFeedForwardNet(d_model, 256*4)
LN_EPS = 1e-5
PACK_LANES = 128        # lane width of the packed small-param slab


def encoder_layer_kernel(x_ref, wqkv_ref, wo_ref, w1_ref, w2_ref, pk_ref,
                         out_ref, attn_ref, *, batch, seq, n_heads):
    """Single grid step: the whole (B*S, D) activation slab lives in VMEM."""
    BS, D = x_ref.shape
    hd = D // n_heads

    # All six tiny vector params arrive in one (2, 128) slab -> static lane slices.
    pk = pk_ref[...]
    bqkv = pk[0:1, 0:3 * D]          # in_proj bias (Q slice pre-scaled host-side)
    bo = pk[0:1, 3 * D:4 * D]        # out_proj bias
    g1 = pk[1:2, 0:D]                # layernorm1 weight
    b1 = pk[1:2, D:2 * D]            # layernorm1 bias
    g2 = pk[1:2, 2 * D:3 * D]        # layernorm2 weight
    b2 = pk[1:2, 3 * D:4 * D]        # layernorm2 bias

    def layer_norm(v, gamma, beta):
        mu = jnp.mean(v, axis=-1, keepdims=True)
        var = jnp.mean((v - mu) ** 2, axis=-1, keepdims=True)   # biased var (PyTorch)
        return (v - mu) * jax.lax.rsqrt(var + LN_EPS) * gamma + beta

    x = x_ref[...]                                               # (BS, D) f32

    # --- self attention (torch.nn.MultiheadAttention semantics) ---
    # One QKV matmul over all B*S rows; bf16 operands on the MXU, f32 accumulation.
    # The 1/sqrt(hd) scale is already folded into W_q / b_q host-side.
    qkv = jnp.dot(x.astype(jnp.bfloat16), wqkv_ref[...],
                  preferred_element_type=jnp.float32) + bqkv     # (BS, 3D) f32
    q3 = qkv[:, :D].reshape(batch, seq, D)
    k3 = qkv[:, D:2 * D].reshape(batch, seq, D)
    v3 = qkv[:, 2 * D:].reshape(batch, seq, D)

    attn_sum = jnp.zeros((batch, seq, seq), jnp.float32)
    ctx_heads = []
    for h in range(n_heads):                                     # static unroll over heads
        sl = slice(h * hd, (h + 1) * hd)
        s = jnp.einsum('bqd,bkd->bqk', q3[..., sl], k3[..., sl],
                       preferred_element_type=jnp.float32)       # (B, S, S)
        s = s - jnp.max(s, axis=-1, keepdims=True)
        e = jnp.exp(s)
        p = e * (1.0 / jnp.sum(e, axis=-1, keepdims=True))       # exact: rows sum to 1
        attn_sum = attn_sum + p
        ctx_heads.append(jnp.einsum('bqk,bkd->bqd', p, v3[..., sl],
                                    preferred_element_type=jnp.float32))  # (B, S, hd)

    # averaged attention weights (average_attn_weights=True default)
    attn_ref[...] = attn_sum * (1.0 / n_heads)

    # concat heads, single out_proj matmul (wo pre-transposed, bf16)
    ctx = jnp.concatenate(ctx_heads, axis=-1).reshape(BS, D)     # (BS, D) f32
    attn_out = jnp.dot(ctx.astype(jnp.bfloat16), wo_ref[...],
                       preferred_element_type=jnp.float32) + bo

    # --- layernorm1(attn_out + x) ---
    h1 = layer_norm(attn_out + x, g1, b1)

    # --- PoswiseFeedForwardNet: Linear->ReLU->Linear (no bias), residual, fresh LayerNorm ---
    # bf16 weights, f32 accumulation; hidden activation kept in bf16 once (ReLU in bf16).
    hmid = jnp.maximum(
        jnp.dot(h1.astype(jnp.bfloat16), w1_ref[...],
                preferred_element_type=jnp.float32).astype(jnp.bfloat16), 0.0)  # (BS, dff) bf16
    ffn = jnp.dot(hmid, w2_ref[...], preferred_element_type=jnp.float32)        # (BS, D) f32
    h2 = layer_norm(ffn + h1, 1.0, 0.0)   # fresh nn.LayerNorm created in forward: gamma=1, beta=0

    # --- layernorm2(ffn_outputs + attn_outputs) ---
    out_ref[...] = layer_norm(h2 + h1, g2, b2).astype(out_ref.dtype)


def encoder_layer(x, params, n_heads=N_HEADS):
    B, S, D = x.shape
    wqkv, bqkv, wo, bo, w1, w2, g1, b1, g2, b2 = params
    dff = w1.shape[0]
    hd = D // n_heads

    # ---- host-side preprocessing ----
    # Fold 1/sqrt(hd) into the Q projection (weight + bias). Exact vs torch, which scales the
    # projected q (bias included).
    scale = 1.0 / math.sqrt(hd)
    col_scale = jnp.concatenate([jnp.full((D,), scale, jnp.float32),
                                 jnp.ones((2 * D,), jnp.float32)])
    wqkv_t = (wqkv * col_scale[:, None]).T.astype(jnp.bfloat16)   # (D, 3D)  bf16
    wo_t = wo.T.astype(jnp.bfloat16)                              # (D, D)   bf16
    w1_t = w1.T.astype(jnp.bfloat16)                              # (D, dff) bf16
    w2_t = w2.T.astype(jnp.bfloat16)                              # (dff, D) bf16

    # Pack the six tiny vector params (256 floats) into one (2, 128) slab -> one prologue DMA.
    assert 4 * D <= PACK_LANES, "param packing assumes 4*d_model <= 128"
    def _pad(v):
        return jnp.pad(v, (0, PACK_LANES - v.shape[0]))
    row0 = _pad(jnp.concatenate([bqkv[0] * col_scale, bo[0]]))
    row1 = _pad(jnp.concatenate([g1[0], b1[0], g2[0], b2[0]]))
    packed = jnp.stack([row0, row1]).astype(jnp.float32)          # (2, 128)

    x_flat = x.reshape(B * S, D)                 # feed all B*S rows to the MXU at once

    grid_spec = pltpu.PrefetchScalarGridSpec(
        num_scalar_prefetch=0,
        grid=(1,),                               # single step: no per-batch grid overhead
        in_specs=[
            pl.BlockSpec((B * S, D), lambda i: (0, 0)),        # x (flattened, f32)
            pl.BlockSpec((D, 3 * D), lambda i: (0, 0)),        # in_proj_weight.T (bf16, Q scaled)
            pl.BlockSpec((D, D), lambda i: (0, 0)),            # out_proj.weight.T (bf16)
            pl.BlockSpec((D, dff), lambda i: (0, 0)),          # fc[0].weight.T (bf16)
            pl.BlockSpec((dff, D), lambda i: (0, 0)),          # fc[2].weight.T (bf16)
            pl.BlockSpec((2, PACK_LANES), lambda i: (0, 0)),   # packed small params (f32)
        ],
        out_specs=[
            pl.BlockSpec((B * S, D), lambda i: (0, 0)),        # encoder output (flattened)
            pl.BlockSpec((B, S, S), lambda i: (0, 0, 0)),      # averaged attn weights
        ],
    )
    out_flat, attn = pl.pallas_call(
        partial(encoder_layer_kernel, batch=B, seq=S, n_heads=n_heads),
        out_shape=(jax.ShapeDtypeStruct((B * S, D), jnp.float32),
                   jax.ShapeDtypeStruct((B, S, S), jnp.float32)),
        grid_spec=grid_spec,
        compiler_params=pltpu.CompilerParams(
            dimension_semantics=("arbitrary",)),   # single step; nothing to shard across TCs
    )(x_flat, wqkv_t, wo_t, w1_t, w2_t, packed)
    return out_flat.reshape(B, S, D), attn


def encoder_layer_ref(x, params, n_heads=N_HEADS):
    """Pure-JAX reference (mirrors torch semantics) for a sanity check."""
    wqkv, bqkv, wo, bo, w1, w2, g1, b1, g2, b2 = params
    B, S, D = x.shape
    hd = D // n_heads

    def ln(v, g, b):
        mu = jnp.mean(v, axis=-1, keepdims=True)
        var = jnp.mean((v - mu) ** 2, axis=-1, keepdims=True)
        return (v - mu) * jax.lax.rsqrt(var + LN_EPS) * g + b

    qkv = x @ wqkv.T + bqkv[0]
    q, k, v = qkv[..., :D], qkv[..., D:2 * D], qkv[..., 2 * D:]
    q = q.reshape(B, S, n_heads, hd).transpose(0, 2, 1, 3) / math.sqrt(hd)
    k = k.reshape(B, S, n_heads, hd).transpose(0, 2, 1, 3)
    v = v.reshape(B, S, n_heads, hd).transpose(0, 2, 1, 3)
    p = jax.nn.softmax(jnp.einsum('bhqd,bhkd->bhqk', q, k), axis=-1)
    ctx = jnp.einsum('bhqk,bhkd->bhqd', p, v).transpose(0, 2, 1, 3).reshape(B, S, D)
    attn_avg = p.mean(axis=1)
    ao = ctx @ wo.T + bo[0]
    h1 = ln(ao + x, g1[0], b1[0])
    ffn = jnp.maximum(h1 @ w1.T, 0.0) @ w2.T
    h2 = ln(ffn + h1, 1.0, 0.0)
    out = ln(h2 + h1, g2[0], b2[0])
    return out, attn_avg


def init_params(key, d_model=D_MODEL, d_ff=D_FF):
    ks = jax.random.split(key, 6)
    wqkv = jax.random.normal(ks[0], (3 * d_model, d_model), jnp.float32) * 0.1
    bqkv = jax.random.normal(ks[1], (1, 3 * d_model), jnp.float32) * 0.02
    wo = jax.random.normal(ks[2], (d_model, d_model), jnp.float32) * 0.1
    bo = jax.random.normal(ks[3], (1, d_model), jnp.float32) * 0.02
    w1 = jax.random.normal(ks[4], (d_ff, d_model), jnp.float32) * 0.05
    w2 = jax.random.normal(ks[5], (d_model, d_ff), jnp.float32) * 0.05
    g1 = jnp.ones((1, d_model), jnp.float32)   # nn.LayerNorm default init
    b1 = jnp.zeros((1, d_model), jnp.float32)
    g2 = jnp.ones((1, d_model), jnp.float32)
    b2 = jnp.zeros((1, d_model), jnp.float32)
    return (wqkv, bqkv, wo, bo, w1, w2, g1, b1, g2, b2)


# TODO(synk): key_padding_mask (and attention dropout) are not implemented; this covers the
#             default mask=None / dropout=0 forward path only.

if __name__ == "__main__":
    key = jax.random.PRNGKey(0)
    kx, kp = jax.random.split(key)
    x = jax.random.normal(kx, (BATCH, SEQ_LEN, D_MODEL), jnp.float32)
    params = init_params(kp)

    out, attn = encoder_layer(x, params)
    out = jax.block_until_ready(out)
    attn = jax.block_until_ready(attn)

    out_expected, attn_expected = encoder_layer_ref(x, params)
    assert jnp.allclose(out, out_expected, atol=5e-2, rtol=5e-2), \
        f"output mismatch: max abs diff {jnp.max(jnp.abs(out - out_expected))}"
    assert jnp.allclose(attn, attn_expected, atol=5e-2, rtol=5e-2), \
        f"attn mismatch: max abs diff {jnp.max(jnp.abs(attn - attn_expected))}"

    print("KERNEL_OK")
</pallas_src>

<mosaic_0001>
module attributes {stable_mosaic.version = 11 : i64} {
  func.func @encoder_layer_kernel(%arg0: i32, %arg1: memref<16x32xf32, #tpu.memory_space<vmem>>, %arg2: memref<32x96xbf16, #tpu.memory_space<vmem>>, %arg3: memref<32x32xbf16, #tpu.memory_space<vmem>>, %arg4: memref<32x1024xbf16, #tpu.memory_space<vmem>>, %arg5: memref<1024x32xbf16, #tpu.memory_space<vmem>>, %arg6: memref<2x128xf32, #tpu.memory_space<vmem>>, %arg7: memref<16x32xf32, #tpu.memory_space<vmem>>, %arg8: memref<2x8x8xf32, #tpu.memory_space<vmem>>) attributes {dimension_semantics = [#tpu.dimension_semantics<arbitrary>], iteration_bounds = array<i64: 1>, scalar_prefetch = 0 : i64, scratch_operands = 0 : i64, tpu.core_type = #tpu.core_type<tc>, window_params = [{pipeline_mode = #tpu.pipeline_mode<synchronous>, transform_indices = @transform_0, window_bounds = array<i64: 16, 32>}, {pipeline_mode = #tpu.pipeline_mode<synchronous>, transform_indices = @transform_1, window_bounds = array<i64: 32, 96>}, {pipeline_mode = #tpu.pipeline_mode<synchronous>, transform_indices = @transform_2, window_bounds = array<i64: 32, 32>}, {pipeline_mode = #tpu.pipeline_mode<synchronous>, transform_indices = @transform_3, window_bounds = array<i64: 32, 1024>}, {pipeline_mode = #tpu.pipeline_mode<synchronous>, transform_indices = @transform_4, window_bounds = array<i64: 1024, 32>}, {pipeline_mode = #tpu.pipeline_mode<synchronous>, transform_indices = @transform_5, window_bounds = array<i64: 2, 128>}, {pipeline_mode = #tpu.pipeline_mode<synchronous>, transform_indices = @transform_6, window_bounds = array<i64: 16, 32>}, {pipeline_mode = #tpu.pipeline_mode<synchronous>, transform_indices = @transform_7, window_bounds = array<i64: 2, 8, 8>}]} {
    %c0 = arith.constant 0 : index
    %c0_0 = arith.constant 0 : index
    %0 = vector.load %arg6[%c0, %c0_0] : memref<2x128xf32, #tpu.memory_space<vmem>>, vector<2x128xf32>
    %1 = vector.extract_strided_slice %0 {offsets = [0, 0], sizes = [1, 96], strides = [1, 1]} : vector<2x128xf32> to vector<1x96xf32>
    %2 = vector.extract_strided_slice %0 {offsets = [0, 96], sizes = [1, 32], strides = [1, 1]} : vector<2x128xf32> to vector<1x32xf32>
    %3 = vector.extract_strided_slice %0 {offsets = [1, 0], sizes = [1, 32], strides = [1, 1]} : vector<2x128xf32> to vector<1x32xf32>
    %4 = vector.extract_strided_slice %0 {offsets = [1, 32], sizes = [1, 32], strides = [1, 1]} : vector<2x128xf32> to vector<1x32xf32>
    %5 = vector.extract_strided_slice %0 {offsets = [1, 64], sizes = [1, 32], strides = [1, 1]} : vector<2x128xf32> to vector<1x32xf32>
    %6 = vector.extract_strided_slice %0 {offsets = [1, 96], sizes = [1, 32], strides = [1, 1]} : vector<2x128xf32> to vector<1x32xf32>
    %c0_1 = arith.constant 0 : index
    %c0_2 = arith.constant 0 : index
    %7 = vector.load %arg1[%c0_1, %c0_2] : memref<16x32xf32, #tpu.memory_space<vmem>>, vector<16x32xf32>
    %8 = arith.truncf %7 : vector<16x32xf32> to vector<16x32xbf16>
    %c0_3 = arith.constant 0 : index
    %c0_4 = arith.constant 0 : index
    %9 = vector.load %arg2[%c0_3, %c0_4] : memref<32x96xbf16, #tpu.memory_space<vmem>>, vector<32x96xbf16>
    %cst = arith.constant dense<0.000000e+00> : vector<16x96xf32>
    %10 = tpu.matmul %8, %9, %cst {dimension_numbers = #tpu.dot_dimension_numbers<[1], [0], [0], [1], [0, 0, 1, 1], [], []>} : vector<16x32xbf16>, vector<32x96xbf16>, vector<16x96xf32> -> vector<16x96xf32>
    %11 = vector.broadcast %1 : vector<1x96xf32> to vector<16x96xf32>
    %12 = arith.addf %10, %11 : vector<16x96xf32>
    %13 = vector.extract_strided_slice %12 {offsets = [0, 0], sizes = [16, 32], strides = [1, 1]} : vector<16x96xf32> to vector<16x32xf32>
    %14 = vector.shape_cast %13 : vector<16x32xf32> to vector<2x8x32xf32>
    %15 = vector.extract_strided_slice %12 {offsets = [0, 32], sizes = [16, 32], strides = [1, 1]} : vector<16x96xf32> to vector<16x32xf32>
    %16 = vector.shape_cast %15 : vector<16x32xf32> to vector<2x8x32xf32>
    %17 = vector.extract_strided_slice %12 {offsets = [0, 64], sizes = [16, 32], strides = [1, 1]} : vector<16x96xf32> to vector<16x32xf32>
    %18 = vector.shape_cast %17 : vector<16x32xf32> to vector<2x8x32xf32>
    %cst_5 = arith.constant 0.000000e+00 : f32
    %19 = vector.broadcast %cst_5 : f32 to vector<2x8x8xf32>
    %20 = vector.extract_strided_slice %14 {offsets = [0, 0, 0], sizes = [2, 8, 8], strides = [1, 1, 1]} : vector<2x8x32xf32> to vector<2x8x8xf32>
    %21 = vector.extract_strided_slice %16 {offsets = [0, 0, 0], sizes = [2, 8, 8], strides = [1, 1, 1]} : vector<2x8x32xf32> to vector<2x8x8xf32>
    "tpu.trace_start"() <{level = 10 : i32, message = "bqd,bkd->bqk"}> : () -> ()
    %cst_6 = arith.constant dense<0.000000e+00> : vector<2x8x8xf32>
    %22 = tpu.matmul %20, %21, %cst_6 {dimension_numbers = #tpu.dot_dimension_numbers<[2], [2], [1], [1], [0, 0, 0, 1, 1, 1], [0], [0]>} : vector<2x8x8xf32>, vector<2x8x8xf32>, vector<2x8x8xf32> -> vector<2x8x8xf32>
    "tpu.trace_stop"() : () -> ()
    %cst_7 = arith.constant dense<0xFF800000> : vector<2x8xf32>
    %23 = vector.multi_reduction <maximumf>, %22, %cst_7 [2] : vector<2x8x8xf32> to vector<2x8xf32>
    %24 = vector.shape_cast %23 : vector<2x8xf32> to vector<2x8x1xf32>
    %25 = vector.broadcast %24 : vector<2x8x1xf32> to vector<2x8x8xf32>
    %26 = arith.subf %22, %25 : vector<2x8x8xf32>
    %27 = math.exp %26 : vector<2x8x8xf32>
    %cst_8 = arith.constant dense<0.000000e+00> : vector<2x8xf32>
    %28 = vector.multi_reduction <add>, %27, %cst_8 [2] : vector<2x8x8xf32> to vector<2x8xf32>
    %29 = vector.shape_cast %28 : vector<2x8xf32> to vector<2x8x1xf32>
    %cst_9 = arith.constant 1.000000e+00 : f32
    %30 = vector.broadcast %cst_9 : f32 to vector<2x8x1xf32>
    %31 = arith.divf %30, %29 : vector<2x8x1xf32>
    %32 = vector.broadcast %31 : vector<2x8x1xf32> to vector<2x8x8xf32>
    %33 = arith.mulf %27, %32 : vector<2x8x8xf32>
    %34 = arith.addf %19, %33 : vector<2x8x8xf32>
    %35 = vector.extract_strided_slice %18 {offsets = [0, 0, 0], sizes = [2, 8, 8], strides = [1, 1, 1]} : vector<2x8x32xf32> to vector<2x8x8xf32>
    "tpu.trace_start"() <{level = 10 : i32, message = "bqk,bkd->bqd"}> : () -> ()
    %cst_10 = arith.constant dense<0.000000e+00> : vector<2x8x8xf32>
    %36 = tpu.matmul %33, %35, %cst_10 {dimension_numbers = #tpu.dot_dimension_numbers<[2], [1], [1], [2], [0, 0, 0, 1, 1, 2], [0], [0]>} : vector<2x8x8xf32>, vector<2x8x8xf32>, vector<2x8x8xf32> -> vector<2x8x8xf32>
    "tpu.trace_stop"() : () -> ()
    %37 = vector.extract_strided_slice %14 {offsets = [0, 0, 8], sizes = [2, 8, 8], strides = [1, 1, 1]} : vector<2x8x32xf32> to vector<2x8x8xf32>
    %38 = vector.extract_strided_slice %16 {offsets = [0, 0, 8], sizes = [2, 8, 8], strides = [1, 1, 1]} : vector<2x8x32xf32> to vector<2x8x8xf32>
    "tpu.trace_start"() <{level = 10 : i32, message = "bqd,bkd->bqk"}> : () -> ()
    %cst_11 = arith.constant dense<0.000000e+00> : vector<2x8x8xf32>
    %39 = tpu.matmul %37, %38, %cst_11 {dimension_numbers = #tpu.dot_dimension_numbers<[2], [2], [1], [1], [0, 0, 0, 1, 1, 1], [0], [0]>} : vector<2x8x8xf32>, vector<2x8x8xf32>, vector<2x8x8xf32> -> vector<2x8x8xf32>
    "tpu.trace_stop"() : () -> ()
    %cst_12 = arith.constant dense<0xFF800000> : vector<2x8xf32>
    %40 = vector.multi_reduction <maximumf>, %39, %cst_12 [2] : vector<2x8x8xf32> to vector<2x8xf32>
    %41 = vector.shape_cast %40 : vector<2x8xf32> to vector<2x8x1xf32>
    %42 = vector.broadcast %41 : vector<2x8x1xf32> to vector<2x8x8xf32>
    %43 = arith.subf %39, %42 : vector<2x8x8xf32>
    %44 = math.exp %43 : vector<2x8x8xf32>
    %cst_13 = arith.constant dense<0.000000e+00> : vector<2x8xf32>
    %45 = vector.multi_reduction <add>, %44, %cst_13 [2] : vector<2x8x8xf32> to vector<2x8xf32>
    %46 = vector.shape_cast %45 : vector<2x8xf32> to vector<2x8x1xf32>
    %cst_14 = arith.constant 1.000000e+00 : f32
    %47 = vector.broadcast %cst_14 : f32 to vector<2x8x1xf32>
    %48 = arith.divf %47, %46 : vector<2x8x1xf32>
    %49 = vector.broadcast %48 : vector<2x8x1xf32> to vector<2x8x8xf32>
    %50 = arith.mulf %44, %49 : vector<2x8x8xf32>
    %51 = arith.addf %34, %50 : vector<2x8x8xf32>
    %52 = vector.extract_strided_slice %18 {offsets = [0, 0, 8], sizes = [2, 8, 8], strides = [1, 1, 1]} : vector<2x8x32xf32> to vector<2x8x8xf32>
    "tpu.trace_start"() <{level = 10 : i32, message = "bqk,bkd->bqd"}> : () -> ()
    %cst_15 = arith.constant dense<0.000000e+00> : vector<2x8x8xf32>
    %53 = tpu.matmul %50, %52, %cst_15 {dimension_numbers = #tpu.dot_dimension_numbers<[2], [1], [1], [2], [0, 0, 0, 1, 1, 2], [0], [0]>} : vector<2x8x8xf32>, vector<2x8x8xf32>, vector<2x8x8xf32> -> vector<2x8x8xf32>
    "tpu.trace_stop"() : () -> ()
    %54 = vector.extract_strided_slice %14 {offsets = [0, 0, 16], sizes = [2, 8, 8], strides = [1, 1, 1]} : vector<2x8x32xf32> to vector<2x8x8xf32>
    %55 = vector.extract_strided_slice %16 {offsets = [0, 0, 16], sizes = [2, 8, 8], strides = [1, 1, 1]} : vector<2x8x32xf32> to vector<2x8x8xf32>
    "tpu.trace_start"() <{level = 10 : i32, message = "bqd,bkd->bqk"}> : () -> ()
    %cst_16 = arith.constant dense<0.000000e+00> : vector<2x8x8xf32>
    %56 = tpu.matmul %54, %55, %cst_16 {dimension_numbers = #tpu.dot_dimension_numbers<[2], [2], [1], [1], [0, 0, 0, 1, 1, 1], [0], [0]>} : vector<2x8x8xf32>, vector<2x8x8xf32>, vector<2x8x8xf32> -> vector<2x8x8xf32>
    "tpu.trace_stop"() : () -> ()
    %cst_17 = arith.constant dense<0xFF800000> : vector<2x8xf32>
    %57 = vector.multi_reduction <maximumf>, %56, %cst_17 [2] : vector<2x8x8xf32> to vector<2x8xf32>
    %58 = vector.shape_cast %57 : vector<2x8xf32> to vector<2x8x1xf32>
    %59 = vector.broadcast %58 : vector<2x8x1xf32> to vector<2x8x8xf32>
    %60 = arith.subf %56, %59 : vector<2x8x8xf32>
    %61 = math.exp %60 : vector<2x8x8xf32>
    %cst_18 = arith.constant dense<0.000000e+00> : vector<2x8xf32>
    %62 = vector.multi_reduction <add>, %61, %cst_18 [2] : vector<2x8x8xf32> to vector<2x8xf32>
    %63 = vector.shape_cast %62 : vector<2x8xf32> to vector<2x8x1xf32>
    %cst_19 = arith.constant 1.000000e+00 : f32
    %64 = vector.broadcast %cst_19 : f32 to vector<2x8x1xf32>
    %65 = arith.divf %64, %63 : vector<2x8x1xf32>
    %66 = vector.broadcast %65 : vector<2x8x1xf32> to vector<2x8x8xf32>
    %67 = arith.mulf %61, %66 : vector<2x8x8xf32>
    %68 = arith.addf %51, %67 : vector<2x8x8xf32>
    %69 = vector.extract_strided_slice %18 {offsets = [0, 0, 16], sizes = [2, 8, 8], strides = [1, 1, 1]} : vector<2x8x32xf32> to vector<2x8x8xf32>
    "tpu.trace_start"() <{level = 10 : i32, message = "bqk,bkd->bqd"}> : () -> ()
    %cst_20 = arith.constant dense<0.000000e+00> : vector<2x8x8xf32>
    %70 = tpu.matmul %67, %69, %cst_20 {dimension_numbers = #tpu.dot_dimension_numbers<[2], [1], [1], [2], [0, 0, 0, 1, 1, 2], [0], [0]>} : vector<2x8x8xf32>, vector<2x8x8xf32>, vector<2x8x8xf32> -> vector<2x8x8xf32>
    "tpu.trace_stop"() : () -> ()
    %71 = vector.extract_strided_slice %14 {offsets = [0, 0, 24], sizes = [2, 8, 8], strides = [1, 1, 1]} : vector<2x8x32xf32> to vector<2x8x8xf32>
    %72 = vector.extract_strided_slice %16 {offsets = [0, 0, 24], sizes = [2, 8, 8], strides = [1, 1, 1]} : vector<2x8x32xf32> to vector<2x8x8xf32>
    "tpu.trace_start"() <{level = 10 : i32, message = "bqd,bkd->bqk"}> : () -> ()
    %cst_21 = arith.constant dense<0.000000e+00> : vector<2x8x8xf32>
    %73 = tpu.matmul %71, %72, %cst_21 {dimension_numbers = #tpu.dot_dimension_numbers<[2], [2], [1], [1], [0, 0, 0, 1, 1, 1], [0], [0]>} : vector<2x8x8xf32>, vector<2x8x8xf32>, vector<2x8x8xf32> -> vector<2x8x8xf32>
    "tpu.trace_stop"() : () -> ()
    %cst_22 = arith.constant dense<0xFF800000> : vector<2x8xf32>
    %74 = vector.multi_reduction <maximumf>, %73, %cst_22 [2] : vector<2x8x8xf32> to vector<2x8xf32>
    %75 = vector.shape_cast %74 : vector<2x8xf32> to vector<2x8x1xf32>
    %76 = vector.broadcast %75 : vector<2x8x1xf32> to vector<2x8x8xf32>
    %77 = arith.subf %73, %76 : vector<2x8x8xf32>
    %78 = math.exp %77 : vector<2x8x8xf32>
    %cst_23 = arith.constant dense<0.000000e+00> : vector<2x8xf32>
    %79 = vector.multi_reduction <add>, %78, %cst_23 [2] : vector<2x8x8xf32> to vector<2x8xf32>
    %80 = vector.shape_cast %79 : vector<2x8xf32> to vector<2x8x1xf32>
    %cst_24 = arith.constant 1.000000e+00 : f32
    %81 = vector.broadcast %cst_24 : f32 to vector<2x8x1xf32>
    %82 = arith.divf %81, %80 : vector<2x8x1xf32>
    %83 = vector.broadcast %82 : vector<2x8x1xf32> to vector<2x8x8xf32>
    %84 = arith.mulf %78, %83 : vector<2x8x8xf32>
    %85 = arith.addf %68, %84 : vector<2x8x8xf32>
    %86 = vector.extract_strided_slice %18 {offsets = [0, 0, 24], sizes = [2, 8, 8], strides = [1, 1, 1]} : vector<2x8x32xf32> to vector<2x8x8xf32>
    "tpu.trace_start"() <{level = 10 : i32, message = "bqk,bkd->bqd"}> : () -> ()
    %cst_25 = arith.constant dense<0.000000e+00> : vector<2x8x8xf32>
    %87 = tpu.matmul %84, %86, %cst_25 {dimension_numbers = #tpu.dot_dimension_numbers<[2], [1], [1], [2], [0, 0, 0, 1, 1, 2], [0], [0]>} : vector<2x8x8xf32>, vector<2x8x8xf32>, vector<2x8x8xf32> -> vector<2x8x8xf32>
    "tpu.trace_stop"() : () -> ()
    %cst_26 = arith.constant 2.500000e-01 : f32
    %88 = vector.broadcast %cst_26 : f32 to vector<2x8x8xf32>
    %89 = arith.mulf %85, %88 : vector<2x8x8xf32>
    %c0_27 = arith.constant 0 : index
    %c0_28 = arith.constant 0 : index
    %c0_29 = arith.constant 0 : index
    %90 = vector.load %arg8[%c0_27, %c0_28, %c0_29] : memref<2x8x8xf32, #tpu.memory_space<vmem>>, vector<2x8x8xf32>
    tpu.vector_store %arg8[%c0_27, %c0_28, %c0_29], %89 {strides = array<i32>} : memref<2x8x8xf32, #tpu.memory_space<vmem>>, vector<2x8x8xf32>,
    %91 = tpu.concatenate %36, %53, %70, %87 in 2 : vector<2x8x8xf32>, vector<2x8x8xf32>, vector<2x8x8xf32>, vector<2x8x8xf32> -> vector<2x8x32xf32>
    %92 = vector.shape_cast %91 : vector<2x8x32xf32> to vector<16x32xf32>
    %93 = arith.truncf %92 : vector<16x32xf32> to vector<16x32xbf16>
    %c0_30 = arith.constant 0 : index
    %c0_31 = arith.constant 0 : index
    %94 = vector.load %arg3[%c0_30, %c0_31] : memref<32x32xbf16, #tpu.memory_space<vmem>>, vector<32x32xbf16>
    %cst_32 = arith.constant dense<0.000000e+00> : vector<16x32xf32>
    %95 = tpu.matmul %93, %94, %cst_32 {dimension_numbers = #tpu.dot_dimension_numbers<[1], [0], [0], [1], [0, 0, 1, 1], [], []>} : vector<16x32xbf16>, vector<32x32xbf16>, vector<16x32xf32> -> vector<16x32xf32>
    %96 = vector.broadcast %2 : vector<1x32xf32> to vector<16x32xf32>
    %97 = arith.addf %95, %96 : vector<16x32xf32>
    %98 = arith.addf %97, %7 : vector<16x32xf32>
    %cst_33 = arith.constant dense<0.000000e+00> : vector<16xf32>
    %99 = vector.multi_reduction <add>, %98, %cst_33 [1] : vector<16x32xf32> to vector<16xf32>
    %100 = vector.shape_cast %99 : vector<16xf32> to vector<16x1xf32>
    %cst_34 = arith.constant 3.200000e+01 : f32
    %101 = vector.broadcast %cst_34 : f32 to vector<16x1xf32>
    %102 = arith.divf %100, %101 : vector<16x1xf32>
    %103 = vector.broadcast %102 : vector<16x1xf32> to vector<16x32xf32>
    %104 = arith.subf %98, %103 : vector<16x32xf32>
    %105 = arith.mulf %104, %104 : vector<16x32xf32>
    %cst_35 = arith.constant dense<0.000000e+00> : vector<16xf32>
    %106 = vector.multi_reduction <add>, %105, %cst_35 [1] : vector<16x32xf32> to vector<16xf32>
    %107 = vector.shape_cast %106 : vector<16xf32> to vector<16x1xf32>
    %cst_36 = arith.constant 3.200000e+01 : f32
    %108 = vector.broadcast %cst_36 : f32 to vector<16x1xf32>
    %109 = arith.divf %107, %108 : vector<16x1xf32>
    %110 = vector.broadcast %102 : vector<16x1xf32> to vector<16x32xf32>
    %111 = arith.subf %98, %110 : vector<16x32xf32>
    %cst_37 = arith.constant 9.99999974E-6 : f32
    %112 = vector.broadcast %cst_37 : f32 to vector<16x1xf32>
    %113 = arith.addf %109, %112 : vector<16x1xf32>
    %114 = math.rsqrt %113 : vector<16x1xf32>
    %115 = vector.broadcast %114 : vector<16x1xf32> to vector<16x32xf32>
    %116 = arith.mulf %111, %115 : vector<16x32xf32>
    %117 = vector.broadcast %3 : vector<1x32xf32> to vector<16x32xf32>
    %118 = arith.mulf %116, %117 : vector<16x32xf32>
    %119 = vector.broadcast %4 : vector<1x32xf32> to vector<16x32xf32>
    %120 = arith.addf %118, %119 : vector<16x32xf32>
    %121 = arith.truncf %120 : vector<16x32xf32> to vector<16x32xbf16>
    %c0_38 = arith.constant 0 : index
    %c0_39 = arith.constant 0 : index
    %122 = vector.load %arg4[%c0_38, %c0_39] : memref<32x1024xbf16, #tpu.memory_space<vmem>>, vector<32x1024xbf16>
    %cst_40 = arith.constant dense<0.000000e+00> : vector<16x1024xf32>
    %123 = tpu.matmul %121, %122, %cst_40 {dimension_numbers = #tpu.dot_dimension_numbers<[1], [0], [0], [1], [0, 0, 1, 1], [], []>} : vector<16x32xbf16>, vector<32x1024xbf16>, vector<16x1024xf32> -> vector<16x1024xf32>
    %124 = arith.truncf %123 : vector<16x1024xf32> to vector<16x1024xbf16>
    %cst_41 = arith.constant 0.000000e+00 : bf16
    %125 = vector.broadcast %cst_41 : bf16 to vector<16x1024xbf16>
    %126 = arith.maximumf %124, %125 : vector<16x1024xbf16>
    %c0_42 = arith.constant 0 : index
    %c0_43 = arith.constant 0 : index
    %127 = vector.load %arg5[%c0_42, %c0_43] : memref<1024x32xbf16, #tpu.memory_space<vmem>>, vector<1024x32xbf16>
    %cst_44 = arith.constant dense<0.000000e+00> : vector<16x32xf32>
    %128 = tpu.matmul %126, %127, %cst_44 {dimension_numbers = #tpu.dot_dimension_numbers<[1], [0], [0], [1], [0, 0, 1, 1], [], []>} : vector<16x1024xbf16>, vector<1024x32xbf16>, vector<16x32xf32> -> vector<16x32xf32>
    %129 = arith.addf %128, %120 : vector<16x32xf32>
    %cst_45 = arith.constant dense<0.000000e+00> : vector<16xf32>
    %130 = vector.multi_reduction <add>, %129, %cst_45 [1] : vector<16x32xf32> to vector<16xf32>
    %131 = vector.shape_cast %130 : vector<16xf32> to vector<16x1xf32>
    %cst_46 = arith.constant 3.200000e+01 : f32
    %132 = vector.broadcast %cst_46 : f32 to vector<16x1xf32>
    %133 = arith.divf %131, %132 : vector<16x1xf32>
    %134 = vector.broadcast %133 : vector<16x1xf32> to vector<16x32xf32>
    %135 = arith.subf %129, %134 : vector<16x32xf32>
    %136 = arith.mulf %135, %135 : vector<16x32xf32>
    %cst_47 = arith.constant dense<0.000000e+00> : vector<16xf32>
    %137 = vector.multi_reduction <add>, %136, %cst_47 [1] : vector<16x32xf32> to vector<16xf32>
    %138 = vector.shape_cast %137 : vector<16xf32> to vector<16x1xf32>
    %cst_48 = arith.constant 3.200000e+01 : f32
    %139 = vector.broadcast %cst_48 : f32 to vector<16x1xf32>
    %140 = arith.divf %138, %139 : vector<16x1xf32>
    %141 = vector.broadcast %133 : vector<16x1xf32> to vector<16x32xf32>
    %142 = arith.subf %129, %141 : vector<16x32xf32>
    %cst_49 = arith.constant 9.99999974E-6 : f32
    %143 = vector.broadcast %cst_49 : f32 to vector<16x1xf32>
    %144 = arith.addf %140, %143 : vector<16x1xf32>
    %145 = math.rsqrt %144 : vector<16x1xf32>
    %146 = vector.broadcast %145 : vector<16x1xf32> to vector<16x32xf32>
    %147 = arith.mulf %142, %146 : vector<16x32xf32>
    %cst_50 = arith.constant 1.000000e+00 : f32
    %148 = vector.broadcast %cst_50 : f32 to vector<16x32xf32>
    %149 = arith.mulf %147, %148 : vector<16x32xf32>
    %cst_51 = arith.constant 0.000000e+00 : f32
    %150 = vector.broadcast %cst_51 : f32 to vector<16x32xf32>
    %151 = arith.addf %149, %150 : vector<16x32xf32>
    %152 = arith.addf %151, %120 : vector<16x32xf32>
    %cst_52 = arith.constant dense<0.000000e+00> : vector<16xf32>
    %153 = vector.multi_reduction <add>, %152, %cst_52 [1] : vector<16x32xf32> to vector<16xf32>
    %154 = vector.shape_cast %153 : vector<16xf32> to vector<16x1xf32>
    %cst_53 = arith.constant 3.200000e+01 : f32
    %155 = vector.broadcast %cst_53 : f32 to vector<16x1xf32>
    %156 = arith.divf %154, %155 : vector<16x1xf32>
    %157 = vector.broadcast %156 : vector<16x1xf32> to vector<16x32xf32>
    %158 = arith.subf %152, %157 : vector<16x32xf32>
    %159 = arith.mulf %158, %158 : vector<16x32xf32>
    %cst_54 = arith.constant dense<0.000000e+00> : vector<16xf32>
    %160 = vector.multi_reduction <add>, %159, %cst_54 [1] : vector<16x32xf32> to vector<16xf32>
    %161 = vector.shape_cast %160 : vector<16xf32> to vector<16x1xf32>
    %cst_55 = arith.constant 3.200000e+01 : f32
    %162 = vector.broadcast %cst_55 : f32 to vector<16x1xf32>
    %163 = arith.divf %161, %162 : vector<16x1xf32>
    %164 = vector.broadcast %156 : vector<16x1xf32> to vector<16x32xf32>
    %165 = arith.subf %152, %164 : vector<16x32xf32>
    %cst_56 = arith.constant 9.99999974E-6 : f32
    %166 = vector.broadcast %cst_56 : f32 to vector<16x1xf32>
    %167 = arith.addf %163, %166 : vector<16x1xf32>
    %168 = math.rsqrt %167 : vector<16x1xf32>
    %169 = vector.broadcast %168 : vector<16x1xf32> to vector<16x32xf32>
    %170 = arith.mulf %165, %169 : vector<16x32xf32>
    %171 = vector.broadcast %5 : vector<1x32xf32> to vector<16x32xf32>
    %172 = arith.mulf %170, %171 : vector<16x32xf32>
    %173 = vector.broadcast %6 : vector<1x32xf32> to vector<16x32xf32>
    %174 = arith.addf %172, %173 : vector<16x32xf32>
    %c0_57 = arith.constant 0 : index
    %c0_58 = arith.constant 0 : index
    %175 = vector.load %arg7[%c0_57, %c0_58] : memref<16x32xf32, #tpu.memory_space<vmem>>, vector<16x32xf32>
    tpu.vector_store %arg7[%c0_57, %c0_58], %174 {strides = array<i32>} : memref<16x32xf32, #tpu.memory_space<vmem>>, vector<16x32xf32>,
    return
  }
  func.func @transform_0(%arg0: i32) -> (i32, i32) {
    %c0_i32 = arith.constant 0 : i32
    %c0_i32_0 = arith.constant 0 : i32
    %c0_i32_1 = arith.constant 0 : i32
    return %c0_i32, %c0_i32_0 : i32, i32
  }
  func.func @transform_1(%arg0: i32) -> (i32, i32) {
    %c0_i32 = arith.constant 0 : i32
    %c0_i32_0 = arith.constant 0 : i32
    %c0_i32_1 = arith.constant 0 : i32
    return %c0_i32, %c0_i32_0 : i32, i32
  }
  func.func @transform_2(%arg0: i32) -> (i32, i32) {
    %c0_i32 = arith.constant 0 : i32
    %c0_i32_0 = arith.constant 0 : i32
    %c0_i32_1 = arith.constant 0 : i32
    return %c0_i32, %c0_i32_0 : i32, i32
  }
  func.func @transform_3(%arg0: i32) -> (i32, i32) {
    %c0_i32 = arith.constant 0 : i32
    %c0_i32_0 = arith.constant 0 : i32
    %c0_i32_1 = arith.constant 0 : i32
    return %c0_i32, %c0_i32_0 : i32, i32
  }
  func.func @transform_4(%arg0: i32) -> (i32, i32) {
    %c0_i32 = arith.constant 0 : i32
    %c0_i32_0 = arith.constant 0 : i32
    %c0_i32_1 = arith.constant 0 : i32
    return %c0_i32, %c0_i32_0 : i32, i32
  }
  func.func @transform_5(%arg0: i32) -> (i32, i32) {
    %c0_i32 = arith.constant 0 : i32
    %c0_i32_0 = arith.constant 0 : i32
    %c0_i32_1 = arith.constant 0 : i32
    return %c0_i32, %c0_i32_0 : i32, i32
  }
  func.func @transform_6(%arg0: i32) -> (i32, i32) {
    %c0_i32 = arith.constant 0 : i32
    %c0_i32_0 = arith.constant 0 : i32
    %c0_i32_1 = arith.constant 0 : i32
    return %c0_i32, %c0_i32_0 : i32, i32
  }
  func.func @transform_7(%arg0: i32) -> (i32, i32, i32) {
    %c0_i32 = arith.constant 0 : i32
    %c0_i32_0 = arith.constant 0 : i32
    %c0_i32_1 = arith.constant 0 : i32
    %c0_i32_2 = arith.constant 0 : i32
    return %c0_i32, %c0_i32_0, %c0_i32_1 : i32, i32, i32
  }
}

</mosaic_0001>

<bundles_post_ra>
// kernel: tpu_custom_call.1
= control target key start
LH: loop header
LB: loop body
LE: loop exit
PB: predicated region body
PF: predicated region fallthrough
CT: control target
= control target key end

     0   :  { %13 = vsyncpa [#allocation3], 0  ;;  %v3166_v1 = vmov 0.0   ;;  %vm3167_vm0 = vmmov 0   ;;  %vm52_vm1 = vcmask 261120   ;;  %s3753_s0 = inlined_call_operand.vmem [shape: f32[16,32], index: 0, kind: input, shape index: {}]   ;;  %s3754_s1 = inlined_call_operand.vmem [shape: bf16[32,96], index: 1, kind: input, shape index: {}]   ;;  %s3755_s2 = inlined_call_operand.vmem [shape: bf16[32,32], index: 2, kind: input, shape index: {}]   ;;  %s3756_s3 = inlined_call_operand.vmem [shape: bf16[32,1024], index: 3, kind: input, shape index: {}]   ;;  %s3757_s4 = inlined_call_operand.vmem [shape: bf16[1024,32], index: 4, kind: input, shape index: {}]   ;;  %s3758_s5 = inlined_call_operand.vmem [shape: f32[2,128], index: 5, kind: input, shape index: {}]   ;;  %s3759_s6 = inlined_call_operand.hbm [shape: f32[16,32], index: 6, kind: output, shape index: {0}]   ;;  %s3760_s7 = inlined_call_operand.hbm [shape: f32[2,8,8], index: 7, kind: output, shape index: {1}]  }
   0x1   :  { %v3010_v0 = vld [vmem:[%s3754_s1 + $0x8] sm:$0xff]   ;;  %2878 = vmatprep.subr.bf16.mxu0 %v3166_v1  ;;  %2886 = vmatprep.subr.mxu1 %v3166_v1  ;;  %v3011_v2 = vld [vmem:[%s3754_s1] sm:$0xff]  }
   0x2   :  { %2879 = vmatpush3.bf16.msra.mxu0 %v3010_v0  ;;  %2882 = vmatprep.mubr.msk.bf16.mxu0 %vm3167_vm0, %v3166_v1  ;;  %v3240_v3 = vld [vmem:[%s3753_s0] sm:$0xff]  ;;  %v3245_v4 = vld [vmem:[%s3753_s0 + $0x8] sm:$0xff] }
   0x3   :  { %2880 = vmatprep.subr.bf16.mxu0 %v3166_v1  ;;  %2888 = vmatprep.mubr.msk.f32.mxu1 %vm3167_vm0, %v3166_v1  ;;  %v31_v5 = vpack.c.bf16 %v3245_v4, %v3240_v3 }
   0x6   :  { %2881 = vmatpush3.bf16.msra.mxu0 %v3011_v2 }
   0x7   :  { %2901 = vmatprep.subr.mxu0 %v3166_v1 }
   0x9   :  { %2883 = vmatmul.mubr.msk.bf16.vlgmr.msra.gmra.mxu0 %vm52_vm1, %v31_v5 }
   0xa   :  { %2903 = vmatprep.mubr.msk.f32.mxu0 %vm3167_vm0, %v3166_v1 }
   0xb   :  { %14 = vsyncpa [#allocation5], 0  ;;  %v36_v6 = vlaneseq  ;;  %v3262_v9 = vld [vmem:[%s3758_s5] sm:$0x3]  ;;  %s3168_s9 = smov 96   ;;  %vm100_vm2 = vcmask 64512  }
   0xc   :  { %s3169_s5 = smov 64   ;;  %s3170_s10 = smov 88   ;;  %vm1462_vm3 = vcmask 130048   ;;  %vm1465_vm4 = vcmask 195584  }
   0xd   :  { %v3256_v7 = vshrl.u32 %v36_v6, 7  ;;  %s3171_s11 = smov 120   ;;  %s3172_s12 = smov 56  }
   0xe   :  { %s3173_s13 = smov 80   ;;  %s3174_s14 = smov 112  }
   0xf   :  { %v38_v8 = vsub.s32 0, %v3256_v7  ;;  %s3175_s15 = smov 48   ;;  %s3176_s16 = smov 72  }
  0x10   :  { %s3177_s17 = smov 104   ;;  %s3178_s18 = smov 40  }
  0x11   :  { %v3265_v10 = vrot.slane %v3262_v9, %v38_v8  ;;  %s3179_s19 = smov 8   ;;  %s3180_s20 = smov 16  }
  0x12   :  { %s3181_s25 = smov 32   ;;  %s3182_s26 = smov 24  }
  0xc9   :  { %v90_v11 = vpop.f32.mrf.mxu0 }
  0xca   :  { %v3268_v12 = vadd.f32 %v90_v11, %v3265_v10 }
  0xcb   :  { %v2884_v13 = vpop.f32.mrf.mxu0 }
  0xcc   :  { %98 = vrot.lane.b32.xlu0 %v3268_v12, %s3168_s9 }
  0xcd   :  { %v93_v14 = vpop.f32.mrf.mxu0 }
  0xce   :  { %v3273_v15 = vadd.f32 %v93_v14, %v3265_v10 }
  0xcf   :  { %v2885_v16 = vpop.f32.mrf.mxu0 }
  0xd0   :  { %176 = vrot.lane.b32.xlu0 %v3273_v15, %s3168_s9 }
 0x13e   :  { %v99_v17 = vpop.permute.xlu0 %98 }
 0x13f   :  { %2887 = vmatpush3.xpose.msk.msra.mxu1 %vm100_vm2, %v99_v17 }
 0x140   :  { %2891 = vmatprep.subr.mxu1 %v3166_v1 }
 0x142   :  { %2889 = vmatmul.mubr.msk.f32.vlgmr.msra.gmra.mxu1 %vm100_vm2, %v3268_v12  ;;  %v177_v18 = vpop.permute.xlu0 %176 }
 0x143   :  { %2892 = vmatpush3.xpose.msk.msra.mxu1 %vm100_vm2, %v177_v18  ;;  %2893 = vmatprep.mubr.msk.f32.mxu1 %vm3167_vm0, %v3166_v1 }
 0x144   :  { %2896 = vmatprep.subr.mxu1 %v3166_v1 }
 0x146   :  { %2894 = vmatmul.mubr.msk.f32.vlgmr.msra.gmra.mxu1 %vm100_vm2, %v3273_v15 }
 0x147   :  { %2898 = vmatprep.mubr.msk.f32.mxu1 %vm3167_vm0, %v3166_v1 }
 0x202   :  { %v171_v19 = vpop.f32.mrf.mxu1 }
 0x203   :  { %v252_v20 = vsel %vm100_vm2, %v171_v19, -inf }
 0x204   :  { %253 = vmax.xlane.f32.xlu1 %v252_v20  ;;  %v2890_v21 = vpop.f32.mrf.mxu1 }
 0x206   :  { %v248_v22 = vpop.f32.mrf.mxu1 }
 0x207   :  { %v255_v23 = vsel %vm100_vm2, %v248_v22, -inf }
 0x208   :  { %256 = vmax.xlane.f32.xlu1 %v255_v23  ;;  %v2895_v24 = vpop.f32.mrf.mxu1 }
 0x219   :  { %278 = vrot.lane.b32.xlu1 %v3268_v12, %s3169_s5 }
 0x21d   :  { %354 = vrot.lane.b32.xlu1 %v3273_v15, %s3169_s5 }
 0x221   :  { %432 = vrot.lane.b32.xlu1 %v3268_v12, %s3170_s10 }
 0x225   :  { %510 = vrot.lane.b32.xlu1 %v3273_v15, %s3170_s10 }
 0x28d   :  { %v254_v25 = vpop.xlane.xlu1 %253 }
 0x28e   :  { %v258_v26 = vsub.f32 %v171_v19, %v254_v25 }
 0x290   :  { %v260_v27 = vmul.f32 1.442695, %v258_v26 }
 0x291   :  { %v257_v28 = vpop.xlane.xlu1 %256 }
 0x292   :  { %3078 = vpow2.f32 %v260_v27  ;;  %v259_v29 = vsub.f32 %v248_v22, %v257_v28 }
 0x294   :  { %v262_v30 = vmul.f32 1.442695, %v259_v29 }
 0x295   :  { %v279_v31 = vpop.permute.xlu1 %278 }
 0x296   :  { %3080 = vpow2.f32 %v262_v30  ;;  %2897 = vmatpush3.msra.mxu1 %v279_v31 }
 0x297   :  { %2906 = vmatprep.subr.mxu1 %v3166_v1 }
 0x299   :  { %v355_v32 = vpop.permute.xlu1 %354 }
 0x29a   :  { %2902 = vmatpush3.msra.mxu0 %v355_v32 }
 0x29b   :  { %2911 = vmatprep.subr.mxu0 %v3166_v1 }
 0x29d   :  { %v433_v37 = vpop.permute.xlu1 %432 }
 0x29f   :  { %v3079_v33 = vpop.eup %3078 }
 0x2a0   :  { %v264_v34 = vsel %vm100_vm2, %v3079_v33, 0.0 }
 0x2a1   :  { %265 = vadd.xlane.f32.xlu0 %v264_v34  ;;  %v511_v38 = vpop.permute.xlu1 %510 }
 0x2a3   :  { %v3081_v35 = vpop.eup %3080 }
 0x2a4   :  { %v267_v36 = vsel %vm100_vm2, %v3081_v35, 0.0 }
 0x2a5   :  { %268 = vadd.xlane.f32.xlu1 %v267_v36 }
 0x2b6   :  { %508 = vrot.lane.b32.xlu1 %v3273_v15, %s3171_s11 }
 0x2b7   :  { %430 = vrot.lane.b32.xlu0 %v3268_v12, %s3171_s11 }
 0x32a   :  { %v266_v39 = vpop.xlane.xlu0 %265 }
 0x32b   :  { %3082 = vrcp.f32 %v266_v39 }
 0x32e   :  { %v269_v40 = vpop.xlane.xlu1 %268  ;;  %v431_v45 = vpop.permute.xlu0 %430 }
 0x32f   :  { %3084 = vrcp.f32 %v269_v40 }
 0x332   :  { %v509_v46 = vpop.permute.xlu1 %508 }
 0x338   :  { %v3083_v41 = vpop.eup %3082 }
 0x339   :  { %v3303_v42 = vmul.f32 %v3083_v41, %v3079_v33 }
 0x33b   :  { %2899 = vmatmul.mubr.msk.f32.vlgmr.msra.gmra.mxu1 %vm100_vm2, %v3303_v42 }
 0x33c   :  { %v3085_v43 = vpop.eup %3084  ;;  %2907 = vmatpush3.xpose.msk.msra.mxu1 %vm100_vm2, %v433_v37  ;;  %2908 = vmatprep.mubr.msk.f32.mxu1 %vm3167_vm0, %v3166_v1 }
 0x33d   :  { %v3310_v44 = vmul.f32 %v3085_v43, %v3081_v35  ;;  %2916 = vmatprep.subr.mxu1 %v3166_v1 }
 0x33f   :  { %2904 = vmatmul.mubr.msk.f32.vlgmr.msra.gmra.mxu0 %vm100_vm2, %v3310_v44  ;;  %2909 = vmatmul.mubr.msk.f32.vlgmr.msra.gmra.mxu1 %vm100_vm2, %v431_v45 }
 0x340   :  { %2912 = vmatpush3.xpose.msk.msra.mxu0 %vm100_vm2, %v511_v38  ;;  %2913 = vmatprep.mubr.msk.f32.mxu0 %vm3167_vm0, %v3166_v1 }
 0x341   :  { %2921 = vmatprep.subr.mxu0 %v3166_v1  ;;  %2918 = vmatprep.mubr.msk.f32.mxu1 %vm3167_vm0, %v3166_v1 }
 0x343   :  { %2914 = vmatmul.mubr.msk.f32.vlgmr.msra.gmra.mxu0 %vm100_vm2, %v509_v46 }
 0x344   :  { %2923 = vmatprep.mubr.msk.f32.mxu0 %vm3167_vm0, %v3166_v1 }
 0x3fb   :  { %v3325_v47 = vpop.f32.mrf.mxu1 }
 0x3fd   :  { %v2900_v48 = vpop.f32.mrf.mxu1 }
 0x3ff   :  { %v3327_v49 = vpop.f32.mrf.mxu0  ;;  %v504_v50 = vpop.f32.mrf.mxu1 }
 0x400   :  { %v586_v51 = vsel %vm100_vm2, %v504_v50, -inf }
 0x401   :  { %v2905_v52 = vpop.f32.mrf.mxu0  ;;  %587 = vmax.xlane.f32.xlu1 %v586_v51  ;;  %v2910_v53 = vpop.f32.mrf.mxu1 }
 0x403   :  { %v582_v54 = vpop.f32.mrf.mxu0 }
 0x404   :  { %v589_v55 = vsel %vm100_vm2, %v582_v54, -inf }
 0x405   :  { %590 = vmax.xlane.f32.xlu0 %v589_v55  ;;  %v2915_v56 = vpop.f32.mrf.mxu0 }
 0x412   :  { %612 = vrot.lane.b32.xlu1 %v3268_v12, %s3172_s12 }
 0x416   :  { %766 = vrot.lane.b32.xlu1 %v3268_v12, %s3173_s13 }
 0x41a   :  { %844 = vrot.lane.b32.xlu1 %v3273_v15, %s3173_s13 }
 0x41b   :  { %688 = vrot.lane.b32.xlu0 %v3273_v15, %s3172_s12 }
 0x41f   :  { %764 = vrot.lane.b32.xlu0 %v3268_v12, %s3174_s14 }
 0x48a   :  { %v588_v57 = vpop.xlane.xlu1 %587 }
 0x48b   :  { %v592_v58 = vsub.f32 %v504_v50, %v588_v57 }
 0x48d   :  { %v594_v59 = vmul.f32 1.442695, %v592_v58 }
 0x48e   :  { %v613_v60 = vpop.permute.xlu1 %612  ;;  %v591_v61 = vpop.xlane.xlu0 %590 }
 0x48f   :  { %3086 = vpow2.f32 %v594_v59  ;;  %v593_v62 = vsub.f32 %v582_v54, %v591_v61  ;;  %2917 = vmatpush3.msra.mxu1 %v613_v60 }
 0x490   :  { %2926 = vmatprep.subr.mxu1 %v3166_v1 }
 0x491   :  { %v596_v63 = vmul.f32 1.442695, %v593_v62 }
 0x492   :  { %v689_v0 = vpop.permute.xlu0 %688  ;;  %v767_v11 = vpop.permute.xlu1 %766 }
 0x493   :  { %3088 = vpow2.f32 %v596_v63  ;;  %2922 = vmatpush3.msra.mxu0 %v689_v0 }
 0x494   :  { %2931 = vmatprep.subr.mxu0 %v3166_v1 }
 0x496   :  { %v845_v13 = vpop.permute.xlu1 %844  ;;  %v765_v21 = vpop.permute.xlu0 %764 }
 0x49c   :  { %v3087_v2 = vpop.eup %3086 }
 0x49d   :  { %v598_v5 = vsel %vm100_vm2, %v3087_v2, 0.0 }
 0x49e   :  { %599 = vadd.xlane.f32.xlu1 %v598_v5 }
 0x4a0   :  { %v3089_v6 = vpop.eup %3088 }
 0x4a1   :  { %v601_v8 = vsel %vm100_vm2, %v3089_v6, 0.0 }
 0x4a2   :  { %602 = vadd.xlane.f32.xlu1 %v601_v8 }
 0x4b3   :  { %842 = vrot.lane.b32.xlu1 %v3273_v15, %s3174_s14 }
 0x527   :  { %v600_v14 = vpop.xlane.xlu1 %599 }
 0x528   :  { %3090 = vrcp.f32 %v600_v14 }
 0x52b   :  { %v603_v16 = vpop.xlane.xlu1 %602 }
 0x52c   :  { %3092 = vrcp.f32 %v603_v16 }
 0x52f   :  { %v843_v22 = vpop.permute.xlu1 %842 }
 0x535   :  { %v3091_v17 = vpop.eup %3090 }
 0x536   :  { %v3341_v18 = vmul.f32 %v3091_v17, %v3087_v2 }
 0x538   :  { %2919 = vmatmul.mubr.msk.f32.vlgmr.msra.gmra.mxu1 %vm100_vm2, %v3341_v18  ;;  %v610_v54 = vadd.f32 %v3341_v18, %v3303_v42 }
 0x539   :  { %v3093_v19 = vpop.eup %3092  ;;  %2927 = vmatpush3.xpose.msk.msra.mxu1 %vm100_vm2, %v767_v11  ;;  %2928 = vmatprep.mubr.msk.f32.mxu1 %vm3167_vm0, %v3166_v1 }
 0x53a   :  { %v3348_v20 = vmul.f32 %v3093_v19, %v3089_v6  ;;  %2936 = vmatprep.subr.mxu1 %v3166_v1 }
 0x53c   :  { %2924 = vmatmul.mubr.msk.f32.vlgmr.msra.gmra.mxu0 %vm100_vm2, %v3348_v20  ;;  %2929 = vmatmul.mubr.msk.f32.vlgmr.msra.gmra.mxu1 %vm100_vm2, %v765_v21  ;;  %v611_v59 = vadd.f32 %v3348_v20, %v3310_v44 }
 0x53d   :  { %2932 = vmatpush3.xpose.msk.msra.mxu0 %vm100_vm2, %v845_v13  ;;  %2933 = vmatprep.mubr.msk.f32.mxu0 %vm3167_vm0, %v3166_v1 }
 0x53e   :  { %2941 = vmatprep.subr.mxu0 %v3166_v1  ;;  %2938 = vmatprep.mubr.msk.f32.mxu1 %vm3167_vm0, %v3166_v1 }
 0x540   :  { %2934 = vmatmul.mubr.msk.f32.vlgmr.msra.gmra.mxu0 %vm100_vm2, %v843_v22 }
 0x541   :  { %2943 = vmatprep.mubr.msk.f32.mxu0 %vm3167_vm0, %v3166_v1 }
 0x5f8   :  { %v3363_v23 = vpop.f32.mrf.mxu1 }
 0x5fa   :  { %v2920_v24 = vpop.f32.mrf.mxu1 }
 0x5fc   :  { %v3365_v25 = vpop.f32.mrf.mxu0  ;;  %v838_v26 = vpop.f32.mrf.mxu1 }
 0x5fd   :  { %v2995_v27 = vpack.i.bf16 %v3365_v25, %v3363_v23  ;;  %v920_v28 = vsel %vm100_vm2, %v838_v26, -inf }
 0x5fe   :  { %v2925_v29 = vpop.f32.mrf.mxu0  ;;  %921 = vmax.xlane.f32.xlu0 %v920_v28  ;;  %v2930_v30 = vpop.f32.mrf.mxu1 }
 0x600   :  { %v916_v31 = vpop.f32.mrf.mxu0 }
 0x601   :  { %v923_v32 = vsel %vm100_vm2, %v916_v31, -inf }
 0x602   :  { %924 = vmax.xlane.f32.xlu1 %v923_v32  ;;  %v2935_v33 = vpop.f32.mrf.mxu0 }
 0x613   :  { %946 = vrot.lane.b32.xlu1 %v3268_v12, %s3175_s15 }
 0x617   :  { %1100 = vrot.lane.b32.xlu1 %v3268_v12, %s3176_s16 }
 0x61b   :  { %1178 = vrot.lane.b32.xlu1 %v3273_v15, %s3176_s16 }
 0x61f   :  { %1176 = vrot.lane.b32.xlu1 %v3273_v15, %s3177_s17 }
 0x687   :  { %v922_v34 = vpop.xlane.xlu0 %921 }
 0x688   :  { %v926_v35 = vsub.f32 %v838_v26, %v922_v34 }
 0x68a   :  { %v928_v36 = vmul.f32 1.442695, %v926_v35 }
 0x68b   :  { %v925_v37 = vpop.xlane.xlu1 %924 }
 0x68c   :  { %3094 = vpow2.f32 %v928_v36  ;;  %v927_v38 = vsub.f32 %v916_v31, %v925_v37  ;;  %v3012_v37 = vld [vmem:[%s3755_s2 + $0x8] sm:$0xff]  }
 0x68e   :  { %v930_v39 = vmul.f32 1.442695, %v927_v38  ;;  %v3013_v38 = vld [vmem:[%s3755_s2] sm:$0xff]  }
 0x68f   :  { %v947_v40 = vpop.permute.xlu1 %946 }
 0x690   :  { %3096 = vpow2.f32 %v930_v39  ;;  %2937 = vmatpush3.msra.mxu1 %v947_v40 }
 0x691   :  { %2946 = vmatprep.subr.mxu1 %v3166_v1 }
 0x693   :  { %v1101_v52 = vpop.permute.xlu1 %1100 }
 0x697   :  { %v1179_v58 = vpop.permute.xlu1 %1178 }
 0x699   :  { %v3095_v41 = vpop.eup %3094 }
 0x69a   :  { %v932_v43 = vsel %vm100_vm2, %v3095_v41, 0.0 }
 0x69b   :  { %933 = vadd.xlane.f32.xlu0 %v932_v43  ;;  %v1177_v44 = vpop.permute.xlu1 %1176 }
 0x69d   :  { %v3097_v45 = vpop.eup %3096 }
 0x69e   :  { %v935_v46 = vsel %vm100_vm2, %v3097_v45, 0.0 }
 0x69f   :  { %936 = vadd.xlane.f32.xlu0 %v935_v46 }
 0x6b5   :  { %1022 = vrot.lane.b32.xlu0 %v3273_v15, %s3175_s15 }
 0x6b9   :  { %1098 = vrot.lane.b32.xlu0 %v3268_v12, %s3177_s17 }
 0x724   :  { %v934_v48 = vpop.xlane.xlu0 %933 }
 0x725   :  { %3098 = vrcp.f32 %v934_v48 }
 0x728   :  { %v937_v50 = vpop.xlane.xlu0 %936 }
 0x729   :  { %3100 = vrcp.f32 %v937_v50 }
 0x72c   :  { %v1023_v51 = vpop.permute.xlu0 %1022 }
 0x72d   :  { %2942 = vmatpush3.msra.mxu0 %v1023_v51 }
 0x72e   :  { %2951 = vmatprep.subr.mxu0 %v3166_v1 }
 0x730   :  { %v1099_v61 = vpop.permute.xlu0 %1098 }
 0x732   :  { %v3099_v53 = vpop.eup %3098 }
 0x733   :  { %v942_v55 = vmul.f32 %v3099_v53, %v3095_v41 }
 0x735   :  { %2939 = vmatmul.mubr.msk.f32.vlgmr.msra.gmra.mxu1 %vm100_vm2, %v942_v55  ;;  %v3384_v56 = vadd.f32 %v942_v55, %v610_v54 }
 0x736   :  { %v3101_v57 = vpop.eup %3100  ;;  %2947 = vmatpush3.xpose.msk.msra.mxu1 %vm100_vm2, %v1101_v52  ;;  %2948 = vmatprep.mubr.msk.f32.mxu1 %vm3167_vm0, %v3166_v1 }
 0x737   :  { %v943_v60 = vmul.f32 %v3101_v57, %v3097_v45  ;;  %2956 = vmatprep.subr.mxu1 %v3166_v1 }
 0x739   :  { %2944 = vmatmul.mubr.msk.f32.vlgmr.msra.gmra.mxu0 %vm100_vm2, %v943_v60  ;;  %2949 = vmatmul.mubr.msk.f32.vlgmr.msra.gmra.mxu1 %vm100_vm2, %v1099_v61  ;;  %v945_v42 = vadd.f32 %v943_v60, %v611_v59 }
 0x73a   :  { %2952 = vmatpush3.xpose.msk.msra.mxu0 %vm100_vm2, %v1179_v58  ;;  %2953 = vmatprep.mubr.msk.f32.mxu0 %vm3167_vm0, %v3166_v1 }
 0x73b   :  { %2961 = vmatprep.subr.mxu0 %v3166_v1  ;;  %2958 = vmatprep.mubr.msk.f32.mxu1 %vm3167_vm0, %v3166_v1 }
 0x73d   :  { %2954 = vmatmul.mubr.msk.f32.vlgmr.msra.gmra.mxu0 %vm100_vm2, %v1177_v44 }
 0x73e   :  { %2963 = vmatprep.mubr.msk.f32.mxu0 %vm3167_vm0, %v3166_v1 }
 0x7f5   :  { %v1018_v62 = vpop.f32.mrf.mxu1 }
 0x7f7   :  { %v2940_v63 = vpop.f32.mrf.mxu1 }
 0x7f9   :  { %v1094_v0 = vpop.f32.mrf.mxu0  ;;  %v1172_v2 = vpop.f32.mrf.mxu1 }
 0x7fa   :  { %v1254_v5 = vsel %vm100_vm2, %v1172_v2, -inf  ;;  %v3000_v16 = vpack.i.bf16 %v1094_v0, %v1018_v62 }
 0x7fb   :  { %v2945_v6 = vpop.f32.mrf.mxu0  ;;  %1255 = vmax.xlane.f32.xlu0 %v1254_v5  ;;  %v2950_v8 = vpop.f32.mrf.mxu1 }
 0x7fd   :  { %v1250_v11 = vpop.f32.mrf.mxu0 }
 0x7fe   :  { %v1257_v13 = vsel %vm100_vm2, %v1250_v11, -inf }
 0x7ff   :  { %1258 = vmax.xlane.f32.xlu1 %v1257_v13  ;;  %v2955_v14 = vpop.f32.mrf.mxu0 }
 0x810   :  { %1280 = vrot.lane.b32.xlu1 %v3268_v12, %s3178_s18 }
 0x814   :  { %2996 = vrot.lane.b32.xlu1 %v2995_v27, %s3179_s19 }
 0x818   :  { %3001 = vrot.lane.b32.xlu1 %v3000_v16, %s3180_s20 }
 0x81c   :  { %1486 = vrot.lane.b32.xlu1 %v3265_v10, %s3181_s25 }
 0x884   :  { %v1256_v17 = vpop.xlane.xlu0 %1255 }
 0x885   :  { %v1260_v18 = vsub.f32 %v1172_v2, %v1256_v17 }
 0x887   :  { %v1262_v19 = vmul.f32 1.442695, %v1260_v18 }
 0x888   :  { %v1259_v20 = vpop.xlane.xlu1 %1258 }
 0x889   :  { %3102 = vpow2.f32 %v1262_v19  ;;  %v1261_v21 = vsub.f32 %v1250_v11, %v1259_v20  ;;  %v1564_v11 = vsub.s32 1, %v3256_v7  ;;  %v1583_v7 = vld [vmem:[%s3756_s3 + $0x40] sm:$0xff] }
 0x88b   :  { %v1264_v22 = vmul.f32 1.442695, %v1261_v21  ;;  %v3441_v13 = vrot.slane %v3262_v9, %v1564_v11  ;;  %v1587_v9 = vld [vmem:[%s3756_s3 + $0x60] sm:$0xff]  ;;  %v3017_v11 = vld [vmem:[%s3757_s4 + $0xb8] sm:$0xff]  }
 0x88c   :  { %v1281_v24 = vpop.permute.xlu1 %1280 }
 0x88d   :  { %3104 = vpow2.f32 %v1264_v22  ;;  %2957 = vmatpush3.msra.mxu1 %v1281_v24  ;;  %v1584_v24 = vld [vmem:[%s3756_s3 + $0x48] sm:$0xff] }
 0x88e   :  { %2966 = vmatprep.subr.bf16.mxu1 %v3166_v1 }
 0x890   :  { %v2997_v46 = vpop.permute.xlu1 %2996 }
 0x891   :  { %v2999_v50 = vunpack.i.h.bf16 %v2997_v46 }
 0x893   :  { %v1461_v54 = vsel %vm100_vm2, %v3327_v49, %v2999_v50 }
 0x894   :  { %v3002_v48 = vpop.permute.xlu1 %3001 }
 0x895   :  { %v3004_v51 = vunpack.i.h.bf16 %v3002_v48  ;;  %v3003_v52 = vunpack.i.l.bf16 %v3002_v48 }
 0x896   :  { %v3103_v12 = vpop.eup %3102 }
 0x897   :  { %v1266_v26 = vsel %vm100_vm2, %v3103_v12, 0.0  ;;  %v1464_v57 = vsel %vm1462_vm3, %v1461_v54, %v3004_v51 }
 0x898   :  { %1267 = vadd.xlane.f32.xlu0 %v1266_v26  ;;  %v1588_v26 = vld [vmem:[%s3756_s3 + $0x68] sm:$0xff] }
 0x89a   :  { %v3105_v23 = vpop.eup %3104 }
 0x89b   :  { %v1269_v25 = vsel %vm100_vm2, %v3105_v23, 0.0 }
 0x89c   :  { %1270 = vadd.xlane.f32.xlu0 %v1269_v25  ;;  %v2678_v25 = vcombine.low %v1584_v24, %v1588_v26 }
 0x8b2   :  { %1356 = vrot.lane.b32.xlu0 %v3273_v15, %s3178_s18 }
 0x921   :  { %v1268_v27 = vpop.xlane.xlu0 %1267 }
 0x922   :  { %3106 = vrcp.f32 %v1268_v27  ;;  %v2679_v27 = vcombine.high %v1584_v24, %v1588_v26  ;;  %v3030_v24 = vld [vmem:[%s3757_s4 + $0x58] sm:$0xff]  }
 0x923   :  { %v3032_v26 = vld [vmem:[%s3757_s4 + $0x18] sm:$0xff]  }
 0x925   :  { %v1271_v28 = vpop.xlane.xlu0 %1270 }
 0x926   :  { %3108 = vrcp.f32 %v1271_v28  ;;  %v1575_v28 = vld [vmem:[%s3756_s3] sm:$0xff] }
 0x929   :  { %v1357_v29 = vpop.permute.xlu0 %1356 }
 0x92a   :  { %2962 = vmatpush3.msra.mxu0 %v1357_v29  ;;  %v1579_v29 = vld [vmem:[%s3756_s3 + $0x20] sm:$0xff] }
 0x92f   :  { %v3107_v30 = vpop.eup %3106 }
 0x930   :  { %v1276_v31 = vmul.f32 %v3107_v30, %v3103_v12  ;;  %v2677_v12 = vcombine.high %v1583_v7, %v1587_v9  ;;  %v1576_v30 = vld [vmem:[%s3756_s3 + $0x8] sm:$0xff] }
 0x932   :  { %2959 = vmatmul.mubr.msk.f32.vlgmr.msra.gmra.mxu1 %vm100_vm2, %v1276_v31  ;;  %v1278_v32 = vadd.f32 %v1276_v31, %v3384_v56  ;;  %1686 = vmatprep.subr.bf16.mxu0 %v2677_v12  ;;  %v2669_v31 = vcombine.high %v1575_v28, %v1579_v29  ;;  %v3031_v12 = vld [vmem:[%s3757_s4 + $0xd8] sm:$0xff]  }
 0x933   :  { %v3109_v33 = vpop.eup %3108  ;;  %2970 = vmatprep.mubr.msk.bf16.mxu1 %vm3167_vm0, %v3166_v1  ;;  %2967 = vmatpush3.bf16.msra.mxu1 %v3012_v37  ;;  %v1586_v37 = vld [vmem:[%s3756_s3 + $0x58] sm:$0xff] }
 0x934   :  { %v1277_v34 = vmul.f32 %v3109_v33, %v3105_v23  ;;  %v1432_v35 = vmul.f32 0.25, %v1278_v32  ;;  %2968 = vmatprep.subr.bf16.mxu1 %v3166_v1  ;;  %v2998_v1 = vunpack.i.l.bf16 %v2997_v46  ;;  %v2676_v23 = vcombine.low %v1583_v7, %v1587_v9  ;;  %v1580_v32 = vld [vmem:[%s3756_s3 + $0x28] sm:$0xff]  ;;  %v3028_v7 = vld [vmem:[%s3757_s4 + $0x20] sm:$0xff]  }
 0x935   :  { %v2668_v33 = vcombine.low %v1575_v28, %v1579_v29  ;;  %v3029_v9 = vld [vmem:[%s3757_s4 + $0xa0] sm:$0xff]   ;;  %v3036_v28 = vld [vmem:[%s3757_s4 + $0x10] sm:$0xff]  }
 0x936   :  { %2964 = vmatmul.mubr.msk.f32.vlgmr.msra.gmra.mxu0 %vm100_vm2, %v1277_v34  ;;  %v1279_v15 = vadd.f32 %v1277_v34, %v945_v42  ;;  %1434 = vst.msk [vmem:[#allocation4] sm:$0xff] %vm100_vm2, %v1432_v35  ;;  %v1460_v10 = vsel %vm100_vm2, %v3325_v47, %v2998_v1  ;;  %v1487_v42 = vpop.permute.xlu1 %1486  ;;  %v2670_v34 = vcombine.low %v1576_v30, %v1580_v32  ;;  %v3037_v29 = vld [vmem:[%s3757_s4 + $0x90] sm:$0xff]  }
 0x937   :  { %2969 = vmatpush3.bf16.msra.mxu1 %v3013_v38  ;;  %v1463_v58 = vsel %vm1462_vm3, %v1460_v10, %v3003_v52  ;;  %1687 = vmatpush1.bf16.msra.mxu0 %v2676_v23  ;;  %v2671_v35 = vcombine.high %v1576_v30, %v1580_v32  ;;  %v3183_v38 = vmov 0   ;;  %v3033_v23 = vld [vmem:[%s3757_s4 + $0x98] sm:$0xff]   ;;  %v3038_v30 = vld [vmem:[%s3757_s4 + $0x48] sm:$0xff]  }
 0x938   :  { %v1433_v36 = vmul.f32 0.25, %v1279_v15  ;;  %1729 = vmatprep.subr.bf16.mxu1 %v2679_v27  ;;  %1688 = vmatprep.subr.bf16.mxu0 %v2669_v31  ;;  %v1585_v15 = vld [vmem:[%s3756_s3 + $0x50] sm:$0xff]  ;;  %v3039_v31 = vld [vmem:[%s3757_s4 + $0xc8] sm:$0xff]  }
 0x939   :  { %1706 = vmatprep.mubr.bf16.mxu0 %v3183_v38  ;;  %v3035_v27 = vld [vmem:[%s3757_s4 + $0xd0] sm:$0xff]   ;;  %v3040_v32 = vld [vmem:[%s3757_s4 + $0x8] sm:$0xff]  }
 0x93a   :  { %1435 = vst.msk [vmem:[#allocation4 + $0x8] sm:$0xff] %vm100_vm2, %v1433_v36  ;;  %v1589_v36 = vld [vmem:[%s3756_s3 + $0x70] sm:$0xff] }
 0x93b   :  { %1689 = vmatpush1.bf16.msra.mxu0 %v2668_v33  ;;  %v3041_v33 = vld [vmem:[%s3757_s4 + $0x88] sm:$0xff]  }
 0x9f2   :  { %v1352_v39 = vpop.f32.mrf.mxu1 }
 0x9f4   :  { %v2960_v40 = vpop.f32.mrf.mxu1 }
 0x9f5   :  { %v1590_v40 = vld [vmem:[%s3756_s3 + $0x78] sm:$0xff] }
 0x9f6   :  { %v1428_v41 = vpop.f32.mrf.mxu0 }
 0x9f7   :  { %v3005_v43 = vpack.i.bf16 %v1428_v41, %v1352_v39  ;;  %v2681_v39 = vcombine.high %v1585_v15, %v1589_v36  ;;  %v2680_v41 = vcombine.low %v1585_v15, %v1589_v36  ;;  %v3044_v15 = vld [vmem:[%s3757_s4] sm:$0xff]  }
 0x9f8   :  { %v2965_v45 = vpop.f32.mrf.mxu0  ;;  %v3045_v36 = vld [vmem:[%s3757_s4 + $0x80] sm:$0xff]  }
 0x9f9   :  { %3006 = vrot.lane.b32.xlu0 %v3005_v43, %s3182_s26  ;;  %v2682_v43 = vcombine.low %v1586_v37, %v1590_v40  ;;  %v2683_v45 = vcombine.high %v1586_v37, %v1590_v40  ;;  %1772 = vmatprep.subr.bf16.mxu0 %v2681_v39  ;;  %v3046_v37 = vld [vmem:[%s3757_s4 + $0x178] sm:$0xff]  }
 0x9fa   :  { %v3047_v39 = vld [vmem:[%s3757_s4 + $0x1f8] sm:$0xff]  }
 0xa6b   :  { %v3007_v53 = vpop.permute.xlu0 %3006 }
 0xa6c   :  { %v3009_v55 = vunpack.i.h.bf16 %v3007_v53  ;;  %v3008_v56 = vunpack.i.l.bf16 %v3007_v53 }
 0xa6e   :  { %v1467_v59 = vsel %vm1465_vm4, %v1464_v57, %v3009_v55  ;;  %v1466_v60 = vsel %vm1465_vm4, %v1463_v58, %v3008_v56 }
 0xa6f   :  { %v1468_v61 = vpack.c.bf16 %v1467_v59, %v1466_v60  ;;  %v1577_v59 = vld [vmem:[%s3756_s3 + $0x10] sm:$0xff] }
 0xa70   :  { %v1581_v60 = vld [vmem:[%s3756_s3 + $0x30] sm:$0xff] }
 0xa71   :  { %2971 = vmatmul.mubr.msk.bf16.vlgmr.msra.gmra.mxu1 %vm52_vm1, %v1468_v61  ;;  %v1578_v61 = vld [vmem:[%s3756_s3 + $0x18] sm:$0xff] }
 0xa72   :  { %1730 = vmatpush1.bf16.msra.mxu1 %v2678_v25  ;;  %1749 = vmatprep.mubr.bf16.mxu1 %v3183_v38  ;;  %v3034_v25 = vld [vmem:[%s3757_s4 + $0x50] sm:$0xff]  }
 0xa73   :  { %1731 = vmatprep.subr.bf16.mxu1 %v2671_v35  ;;  %v3043_v35 = vld [vmem:[%s3757_s4 + $0xc0] sm:$0xff]  }
 0xa76   :  { %1732 = vmatpush1.bf16.msra.mxu1 %v2670_v34  ;;  %v3042_v34 = vld [vmem:[%s3757_s4 + $0x40] sm:$0xff]  }
 0xa77   :  { %1815 = vmatprep.subr.bf16.mxu1 %v2683_v45 }
 0xb31   :  { %v1526_v44 = vpop.f32.mrf.mxu1 }
 0xb32   :  { %v1527_v62 = vadd.f32 %v1526_v44, %v1487_v42 }
 0xb33   :  { %v2972_v63 = vpop.f32.mrf.mxu1 }
 0xb34   :  { %v1533_v0 = vadd.f32 %v1527_v62, %v3240_v3 }
 0xb35   :  { %v1529_v2 = vpop.f32.mrf.mxu1 }
 0xb36   :  { %v1530_v49 = vadd.f32 %v1529_v2, %v1487_v42  ;;  %v1535_v5 = vsel %vm52_vm1, %v1533_v0, 0.0  ;;  %v1582_v42 = vld [vmem:[%s3756_s3 + $0x38] sm:$0xff] }
 0xb37   :  { %1536 = vadd.xlane.f32.xlu0 %v1535_v5  ;;  %v2973_v47 = vpop.f32.mrf.mxu1  ;;  %v2675_v2 = vcombine.high %v1578_v61, %v1582_v42  ;;  %v2674_v5 = vcombine.low %v1578_v61, %v1582_v42 }
 0xb38   :  { %v1534_v6 = vadd.f32 %v1530_v49, %v3245_v4  ;;  %v2672_v49 = vcombine.low %v1577_v59, %v1581_v60  ;;  %v3014_v47 = vld [vmem:[%s3757_s4 + $0x78] sm:$0xff]  }
 0xb3a   :  { %v1538_v8 = vsel %vm52_vm1, %v1534_v6, 0.0 }
 0xb3b   :  { %1539 = vadd.xlane.f32.xlu1 %v1538_v8  ;;  %v3016_v8 = vld [vmem:[%s3757_s4 + $0x38] sm:$0xff]  }
 0xb4c   :  { %1569 = vrot.lane.b32.xlu1 %v3441_v13, %s3168_s9 }
 0xbc0   :  { %v1537_v3 = vpop.xlane.xlu0 %1536 }
 0xbc1   :  { %v1542_v14 = vmul.f32 0.03125, %v1537_v3  ;;  %v3018_v3 = vld [vmem:[%s3757_s4 + $0x70] sm:$0xff]  }
 0xbc3   :  { %v1544_v16 = vsub.f32 %v1533_v0, %v1542_v14  ;;  %v2673_v0 = vcombine.high %v1577_v59, %v1581_v60  ;;  %v3019_v14 = vld [vmem:[%s3757_s4 + $0xf0] sm:$0xff]   ;;  %v3049_v59 = vld [vmem:[%s3757_s4 + $0x1b8] sm:$0xff]  }
 0xbc4   :  { %v1540_v17 = vpop.xlane.xlu1 %1539 }
 0xbc5   :  { %v1543_v18 = vmul.f32 0.03125, %v1540_v17  ;;  %v1546_v19 = vmul.f32 %v1544_v16, %v1544_v16  ;;  %v3021_v17 = vld [vmem:[%s3757_s4 + $0xb0] sm:$0xff]  }
 0xbc7   :  { %v1545_v20 = vsub.f32 %v1534_v6, %v1543_v18  ;;  %v1548_v4 = vsel %vm52_vm1, %v1546_v19, 0.0  ;;  %v3015_v6 = vld [vmem:[%s3757_s4 + $0xf8] sm:$0xff]   ;;  %v3022_v18 = vld [vmem:[%s3757_s4 + $0x68] sm:$0xff]  }
 0xbc8   :  { %1549 = vadd.xlane.f32.xlu0 %v1548_v4  ;;  %v1570_v57 = vpop.permute.xlu1 %1569  ;;  %v3023_v19 = vld [vmem:[%s3757_s4 + $0xe8] sm:$0xff]  }
 0xbc9   :  { %v1547_v21 = vmul.f32 %v1545_v20, %v1545_v20  ;;  %v3025_v4 = vld [vmem:[%s3757_s4 + $0xa8] sm:$0xff]  }
 0xbcb   :  { %v1551_v22 = vsel %vm52_vm1, %v1547_v21, 0.0  ;;  %v3026_v21 = vld [vmem:[%s3757_s4 + $0x60] sm:$0xff]  }
 0xbcc   :  { %1552 = vadd.xlane.f32.xlu0 %v1551_v22  ;;  %v3027_v22 = vld [vmem:[%s3757_s4 + $0xe0] sm:$0xff]  }
 0xc51   :  { %v1550_v46 = vpop.xlane.xlu0 %1549 }
 0xc52   :  { %v1554_v48 = vmul.f32 0.03125, %v1550_v46 }
 0xc54   :  { %v1556_v50 = vadd.f32 1e-05, %v1554_v48 }
 0xc55   :  { %v1553_v1 = vpop.xlane.xlu0 %1552 }
 0xc56   :  { %3110 = vrsqrt.f32 %v1556_v50  ;;  %v1555_v51 = vmul.f32 0.03125, %v1553_v1 }
 0xc58   :  { %v1557_v52 = vadd.f32 1e-05, %v1555_v51 }
 0xc5a   :  { %3112 = vrsqrt.f32 %v1557_v52 }
 0xc63   :  { %v3111_v53 = vpop.eup %3110 }
 0xc64   :  { %v1560_v54 = vmul.f32 %v3111_v53, %v1544_v16  ;;  %v3020_v16 = vld [vmem:[%s3757_s4 + $0x30] sm:$0xff]  }
 0xc66   :  { %v1566_v56 = vmul.f32 %v3441_v13, %v1560_v54 }
 0xc67   :  { %v3113_v10 = vpop.eup %3112 }
 0xc68   :  { %v1561_v55 = vmul.f32 %v3113_v10, %v1545_v20  ;;  %v3499_v44 = vadd.f32 %v1570_v57, %v1566_v56  ;;  %v3024_v20 = vld [vmem:[%s3757_s4 + $0x28] sm:$0xff]  }
 0xc6a   :  { %v1567_v58 = vmul.f32 %v3441_v13, %v1561_v55 }
 0xc6c   :  { %v3501_v62 = vadd.f32 %v1570_v57, %v1567_v58  ;;  %v3048_v58 = vld [vmem:[%s3757_s4 + $0x138] sm:$0xff]  }
 0xc6e   :  { %v1574_v63 = vpack.c.bf16 %v3501_v62, %v3499_v44 }
 0xc70   :  { %2684 = vmatmul.mubr.msk.bf16.vlgmr.msra.gmra.mxu0 %vm52_vm1, %v1574_v63  ;;  %2685 = vmatmul.mubr.msk.bf16.vlgmr.msra.gmra.mxu1 %vm52_vm1, %v1574_v63 }
 0xc71   :  { %1773 = vmatpush1.bf16.msra.mxu0 %v2680_v41  ;;  %1816 = vmatpush1.bf16.msra.mxu1 %v2682_v43 }
 0xc72   :  { %1774 = vmatprep.subr.bf16.mxu0 %v2673_v0  ;;  %1817 = vmatprep.subr.bf16.mxu1 %v2675_v2  ;;  %v3050_v0 = vld [vmem:[%s3757_s4 + $0x170] sm:$0xff]  }
 0xc73   :  { %1792 = vmatprep.mubr.bf16.mxu0 %v3183_v38  ;;  %1835 = vmatprep.mubr.bf16.mxu1 %v3183_v38  ;;  %v3051_v2 = vld [vmem:[%s3757_s4 + $0x1f0] sm:$0xff]  }
 0xc75   :  { %1775 = vmatpush1.bf16.msra.mxu0 %v2672_v49  ;;  %1818 = vmatpush1.bf16.msra.mxu1 %v2674_v5 }
 0xc76   :  { %2790 = vmatprep.subr.bf16.mxu0 %v3014_v47  ;;  %2812 = vmatprep.subr.bf16.mxu1 %v3015_v6  ;;  %v3052_v47 = vld [vmem:[%s3757_s4 + $0x130] sm:$0xff]  }
 0xc77   :  { %v3053_v6 = vld [vmem:[%s3757_s4 + $0x1b0] sm:$0xff]  }
 0xc78   :  { %2686 = vmatmul.mubr.msk.bf16.vlgmr.msra.gmra.mxu0 %vm52_vm1, %v1574_v63  ;;  %2687 = vmatmul.mubr.msk.bf16.vlgmr.msra.gmra.mxu1 %vm52_vm1, %v1574_v63 }
 0xc79   :  { %2791 = vmatpush3.bf16.msra.mxu0 %v3016_v8  ;;  %2813 = vmatpush3.bf16.msra.mxu1 %v3017_v11 }
 0xc7a   :  { %2792 = vmatprep.subr.bf16.mxu0 %v3018_v3  ;;  %2814 = vmatprep.subr.bf16.mxu1 %v3019_v14  ;;  %v3054_v3 = vld [vmem:[%s3757_s4 + $0x168] sm:$0xff]  }
 0xc7b   :  { %v3055_v14 = vld [vmem:[%s3757_s4 + $0x1e8] sm:$0xff]  }
 0xc7d   :  { %2793 = vmatpush3.bf16.msra.mxu0 %v3020_v16  ;;  %2815 = vmatpush3.bf16.msra.mxu1 %v3021_v17 }
 0xc7e   :  { %2794 = vmatprep.subr.bf16.mxu0 %v3022_v18  ;;  %2816 = vmatprep.subr.bf16.mxu1 %v3023_v19 }
 0xc81   :  { %2795 = vmatpush3.bf16.msra.mxu0 %v3024_v20  ;;  %2817 = vmatpush3.bf16.msra.mxu1 %v3025_v4  ;;  %v3056_v20 = vld [vmem:[%s3757_s4 + $0x128] sm:$0xff]  }
 0xc82   :  { %2796 = vmatprep.subr.bf16.mxu0 %v3026_v21  ;;  %2818 = vmatprep.subr.bf16.mxu1 %v3027_v22  ;;  %v3057_v4 = vld [vmem:[%s3757_s4 + $0x1a8] sm:$0xff]   ;;  %v3058_v21 = vld [vmem:[%s3757_s4 + $0x160] sm:$0xff]  }
 0xc83   :  { %v3059_v22 = vld [vmem:[%s3757_s4 + $0x1e0] sm:$0xff]  }
 0xc85   :  { %2797 = vmatpush3.bf16.msra.mxu0 %v3028_v7  ;;  %2819 = vmatpush3.bf16.msra.mxu1 %v3029_v9  ;;  %v3060_v7 = vld [vmem:[%s3757_s4 + $0x120] sm:$0xff]  }
 0xc86   :  { %2798 = vmatprep.subr.bf16.mxu0 %v3030_v24  ;;  %2820 = vmatprep.subr.bf16.mxu1 %v3031_v12  ;;  %v3061_v9 = vld [vmem:[%s3757_s4 + $0x1a0] sm:$0xff]   ;;  %v3062_v24 = vld [vmem:[%s3757_s4 + $0x158] sm:$0xff]  }
 0xc87   :  { %v3063_v12 = vld [vmem:[%s3757_s4 + $0x1d8] sm:$0xff]  }
 0xc89   :  { %2799 = vmatpush3.bf16.msra.mxu0 %v3032_v26  ;;  %2821 = vmatpush3.bf16.msra.mxu1 %v3033_v23  ;;  %v3064_v26 = vld [vmem:[%s3757_s4 + $0x118] sm:$0xff]  }
 0xc8a   :  { %2800 = vmatprep.subr.bf16.mxu0 %v3034_v25  ;;  %2822 = vmatprep.subr.bf16.mxu1 %v3035_v27  ;;  %v3065_v23 = vld [vmem:[%s3757_s4 + $0x198] sm:$0xff]   ;;  %v3066_v25 = vld [vmem:[%s3757_s4 + $0x150] sm:$0xff]  }
 0xc8b   :  { %v3067_v27 = vld [vmem:[%s3757_s4 + $0x1d0] sm:$0xff]  }
 0xc8d   :  { %2801 = vmatpush3.bf16.msra.mxu0 %v3036_v28  ;;  %2823 = vmatpush3.bf16.msra.mxu1 %v3037_v29  ;;  %v3068_v28 = vld [vmem:[%s3757_s4 + $0x110] sm:$0xff]  }
 0xc8e   :  { %2802 = vmatprep.subr.bf16.mxu0 %v3038_v30  ;;  %2824 = vmatprep.subr.bf16.mxu1 %v3039_v31  ;;  %v3069_v29 = vld [vmem:[%s3757_s4 + $0x190] sm:$0xff]   ;;  %v3070_v30 = vld [vmem:[%s3757_s4 + $0x148] sm:$0xff]  }
 0xc8f   :  { %v3071_v31 = vld [vmem:[%s3757_s4 + $0x1c8] sm:$0xff]  }
 0xc91   :  { %2803 = vmatpush3.bf16.msra.mxu0 %v3040_v32  ;;  %2825 = vmatpush3.bf16.msra.mxu1 %v3041_v33  ;;  %v3072_v32 = vld [vmem:[%s3757_s4 + $0x108] sm:$0xff]  }
 0xc92   :  { %2804 = vmatprep.subr.bf16.mxu0 %v3042_v34  ;;  %2826 = vmatprep.subr.bf16.mxu1 %v3043_v35  ;;  %v3073_v33 = vld [vmem:[%s3757_s4 + $0x188] sm:$0xff]   ;;  %v3074_v34 = vld [vmem:[%s3757_s4 + $0x140] sm:$0xff]  }
 0xc93   :  { %v3075_v35 = vld [vmem:[%s3757_s4 + $0x1c0] sm:$0xff]  }
 0xc95   :  { %2805 = vmatpush3.bf16.msra.mxu0 %v3044_v15  ;;  %2827 = vmatpush3.bf16.msra.mxu1 %v3045_v36  ;;  %v3076_v15 = vld [vmem:[%s3757_s4 + $0x100] sm:$0xff]  }
 0xc96   :  { %2834 = vmatprep.subr.bf16.mxu0 %v3046_v37  ;;  %2856 = vmatprep.subr.bf16.mxu1 %v3047_v39  ;;  %v3077_v36 = vld [vmem:[%s3757_s4 + $0x180] sm:$0xff]   ;;  %s3184_s4 = smov [#allocation4]  }
 0xc97   :  { %s2623_s11 = sshll.u32 %s3184_s4, 4  ;;  %s2624_s11 = int_to_ptr.vmem [resolvable:$true] %s2623_s11 }
 0xc98   :  { %s3122_s12 = scalar_lea.vmem %s2624_s11, 256  ;;  %p3127_p1 = scmp.lt.s32.totalorder %s2624_s11, %s2624_s11 }
 0xc99   :  { %p3123_p0 = scmp.ne.s32.totalorder %s2624_s11, %s3122_s12  ;;  %p3128_p2 = scmp.lt.s32.totalorder %s3122_s12, %s3122_s12 }
 0xc9b   :  { %p3129_p3 = por %p3128_p2, %p3127_p1 }
 0xc9d   :  { %p3130_p4 = pnand %p3129_p3, %p3123_p0 }
 0xd30   :  { %v1708_v40 = vpop.f32.mrf.mxu0  ;;  %v1751_v41 = vpop.f32.mrf.mxu1 }
 0xd32   :  { %v1710_v43 = vpop.f32.mrf.mxu0  ;;  %v1753_v45 = vpop.f32.mrf.mxu1 }
 0xd34   :  { %v1712_v46 = vpop.f32.mrf.mxu0  ;;  %v1755_v48 = vpop.f32.mrf.mxu1 }
 0xd35   :  { %v1846_v50 = vpack.c.bf16 %v1712_v46, %v1708_v40  ;;  %v1848_v1 = vpack.c.bf16 %v1755_v48, %v1751_v41 }
 0xd36   :  { %v1714_v51 = vpop.f32.mrf.mxu0  ;;  %v1757_v52 = vpop.f32.mrf.mxu1 }
 0xd37   :  { %v1847_v53 = vpack.c.bf16 %v1714_v51, %v1710_v43  ;;  %v1849_v54 = vpack.c.bf16 %v1757_v52, %v1753_v45  ;;  %v1854_v60 = vmax.bf16 %v3183_v38, %v1846_v50  ;;  %v1856_v61 = vmax.bf16 %v3183_v38, %v1848_v1 }
 0xd38   :  { %v3613_v10 = vpop.f32.mrf.mxu0  ;;  %v3615_v55 = vpop.f32.mrf.mxu1 }
 0xd39   :  { %v1855_v56 = vmax.bf16 %v3183_v38, %v1847_v53  ;;  %v1857_v57 = vmax.bf16 %v3183_v38, %v1849_v54 }
 0xd3a   :  { %v1796_v42 = vpop.f32.mrf.mxu0  ;;  %v1839_v63 = vpop.f32.mrf.mxu1 }
 0xd3b   :  { %2406 = vmatprep.mubr.bf16.mxu0 %v1855_v56  ;;  %2447 = vmatprep.mubr.bf16.mxu1 %v1857_v57 }
 0xd3c   :  { %v3633_v49 = vpop.f32.mrf.mxu0  ;;  %v3635_v5 = vpop.f32.mrf.mxu1  ;;  %2407 = vmatmul.mubr.bf16.vlgmr.msra.gmra.mxu0 %v1854_v60  ;;  %2448 = vmatmul.mubr.bf16.vlgmr.msra.gmra.mxu1 %v1856_v61 }
 0xd3d   :  { %2835 = vmatpush3.bf16.msra.mxu0 %v3048_v58  ;;  %2857 = vmatpush3.bf16.msra.mxu1 %v3049_v59  ;;  %v1850_v37 = vpack.c.bf16 %v3633_v49, %v3613_v10  ;;  %v1852_v39 = vpack.c.bf16 %v3635_v5, %v3615_v55 }
 0xd3e   :  { %v1800_v8 = vpop.f32.mrf.mxu0  ;;  %v1843_v11 = vpop.f32.mrf.mxu1  ;;  %2836 = vmatprep.subr.bf16.mxu0 %v3050_v0  ;;  %2858 = vmatprep.subr.bf16.mxu1 %v3051_v2 }
 0xd3f   :  { %v1851_v16 = vpack.c.bf16 %v1800_v8, %v1796_v42  ;;  %v1853_v17 = vpack.c.bf16 %v1843_v11, %v1839_v63  ;;  %v1858_v40 = vmax.bf16 %v3183_v38, %v1850_v37  ;;  %v1860_v41 = vmax.bf16 %v3183_v38, %v1852_v39 }
 0xd41   :  { %v1859_v18 = vmax.bf16 %v3183_v38, %v1851_v16  ;;  %v1861_v19 = vmax.bf16 %v3183_v38, %v1853_v17  ;;  %2837 = vmatpush3.bf16.msra.mxu0 %v3052_v47  ;;  %2859 = vmatpush3.bf16.msra.mxu1 %v3053_v6 }
 0xd42   :  { %2838 = vmatprep.subr.bf16.mxu0 %v3054_v3  ;;  %2860 = vmatprep.subr.bf16.mxu1 %v3055_v14 }
 0xd43   :  { %2488 = vmatprep.mubr.bf16.mxu0 %v1859_v18  ;;  %2529 = vmatprep.mubr.bf16.mxu1 %v1861_v19 }
 0xd45   :  { %2839 = vmatpush3.bf16.msra.mxu0 %v3056_v20  ;;  %2861 = vmatpush3.bf16.msra.mxu1 %v3057_v4 }
 0xd46   :  { %2840 = vmatprep.subr.bf16.mxu0 %v3058_v21  ;;  %2862 = vmatprep.subr.bf16.mxu1 %v3059_v22 }
 0xd49   :  { %2841 = vmatpush3.bf16.msra.mxu0 %v3060_v7  ;;  %2863 = vmatpush3.bf16.msra.mxu1 %v3061_v9 }
 0xd4a   :  { %2842 = vmatprep.subr.bf16.mxu0 %v3062_v24  ;;  %2864 = vmatprep.subr.bf16.mxu1 %v3063_v12 }
 0xd4d   :  { %2843 = vmatpush3.bf16.msra.mxu0 %v3064_v26  ;;  %2865 = vmatpush3.bf16.msra.mxu1 %v3065_v23 }
 0xd4e   :  { %2844 = vmatprep.subr.bf16.mxu0 %v3066_v25  ;;  %2866 = vmatprep.subr.bf16.mxu1 %v3067_v27 }
 0xd51   :  { %2845 = vmatpush3.bf16.msra.mxu0 %v3068_v28  ;;  %2867 = vmatpush3.bf16.msra.mxu1 %v3069_v29 }
 0xd52   :  { %2846 = vmatprep.subr.bf16.mxu0 %v3070_v30  ;;  %2868 = vmatprep.subr.bf16.mxu1 %v3071_v31 }
 0xd55   :  { %2847 = vmatpush3.bf16.msra.mxu0 %v3072_v32  ;;  %2869 = vmatpush3.bf16.msra.mxu1 %v3073_v33 }
 0xd56   :  { %2848 = vmatprep.subr.bf16.mxu0 %v3074_v34  ;;  %2870 = vmatprep.subr.bf16.mxu1 %v3075_v35 }
 0xd59   :  { %2849 = vmatpush3.bf16.msra.mxu0 %v3076_v15  ;;  %2871 = vmatpush3.bf16.msra.mxu1 %v3077_v36 }
 0xd5c   :  { %2489 = vmatmul.mubr.bf16.vlgmr.msra.gmra.mxu0 %v1858_v40  ;;  %2530 = vmatmul.mubr.bf16.vlgmr.msra.gmra.mxu1 %v1860_v41 }
 0xdfc   :  { %v2806_v43 = vpop.f32.mrf.mxu0  ;;  %v2828_v45 = vpop.f32.mrf.mxu1 }
 0xdfe   :  { %v2807_v46 = vpop.f32.mrf.mxu0  ;;  %v2829_v48 = vpop.f32.mrf.mxu1 }
 0xdff   :  { %v2808_v51 = vadd.f32 %v2807_v46, %v2806_v43  ;;  %v2830_v57 = vadd.f32 %v2829_v48, %v2828_v45 }
 0xe00   :  { %v2809_v50 = vpop.f32.mrf.mxu0  ;;  %v2831_v1 = vpop.f32.mrf.mxu1 }
 0xe01   :  { %v2409_v54 = vadd.f32 %v2808_v51, %v3499_v44 }
 0xe02   :  { %v2810_v52 = vpop.f32.mrf.mxu0  ;;  %v2832_v53 = vpop.f32.mrf.mxu1 }
 0xe03   :  { %v2811_v10 = vadd.f32 %v2810_v52, %v2809_v50  ;;  %v2450_v38 = vadd.f32 %v2830_v57, %v2409_v54  ;;  %v2833_v0 = vadd.f32 %v2832_v53, %v2831_v1 }
 0xe05   :  { %v2412_v60 = vadd.f32 %v2811_v10, %v3501_v62 }
 0xe07   :  { %v2453_v6 = vadd.f32 %v2833_v0, %v2412_v60 }
 0xe1c   :  { %v2850_v55 = vpop.f32.mrf.mxu0  ;;  %v2872_v56 = vpop.f32.mrf.mxu1 }
 0xe1e   :  { %v2851_v58 = vpop.f32.mrf.mxu0  ;;  %v2873_v59 = vpop.f32.mrf.mxu1 }
 0xe1f   :  { %v2852_v61 = vadd.f32 %v2851_v58, %v2850_v55  ;;  %v2874_v49 = vadd.f32 %v2873_v59, %v2872_v56 }
 0xe20   :  { %v2853_v42 = vpop.f32.mrf.mxu0  ;;  %v2875_v63 = vpop.f32.mrf.mxu1 }
 0xe21   :  { %v2491_v2 = vadd.f32 %v2852_v61, %v2450_v38 }
 0xe22   :  { %v2854_v5 = vpop.f32.mrf.mxu0  ;;  %v2876_v47 = vpop.f32.mrf.mxu1 }
 0xe23   :  { %v2855_v8 = vadd.f32 %v2854_v5, %v2853_v42  ;;  %v2532_v11 = vadd.f32 %v2874_v49, %v2491_v2  ;;  %v2877_v14 = vadd.f32 %v2876_v47, %v2875_v63 }
 0xe25   :  { %v2494_v3 = vadd.f32 %v2855_v8, %v2453_v6  ;;  %v2538_v16 = vsel %vm52_vm1, %v2532_v11, 0.0 }
 0xe26   :  { %2539 = vadd.xlane.f32.xlu0 %v2538_v16 }
 0xe27   :  { %v2535_v17 = vadd.f32 %v2877_v14, %v2494_v3 }
 0xe29   :  { %v2541_v18 = vsel %vm52_vm1, %v2535_v17, 0.0 }
 0xe2a   :  { %2542 = vadd.xlane.f32.xlu0 %v2541_v18 }
 0xeaf   :  { %v2540_v19 = vpop.xlane.xlu0 %2539 }
 0xeb0   :  { %v2544_v20 = vmul.f32 0.03125, %v2540_v19 }
 0xeb2   :  { %v2546_v4 = vsub.f32 %v2532_v11, %v2544_v20 }
 0xeb3   :  { %v2543_v21 = vpop.xlane.xlu0 %2542 }
 0xeb4   :  { %v2545_v22 = vmul.f32 0.03125, %v2543_v21  ;;  %v2548_v7 = vmul.f32 %v2546_v4, %v2546_v4 }
 0xeb6   :  { %v2547_v9 = vsub.f32 %v2535_v17, %v2545_v22  ;;  %v2550_v24 = vsel %vm52_vm1, %v2548_v7, 0.0 }
 0xeb7   :  { %2551 = vadd.xlane.f32.xlu0 %v2550_v24 }
 0xeb8   :  { %v2549_v12 = vmul.f32 %v2547_v9, %v2547_v9 }
 0xeba   :  { %v2553_v26 = vsel %vm52_vm1, %v2549_v12, 0.0 }
 0xebb   :  { %2554 = vadd.xlane.f32.xlu0 %v2553_v26 }
 0xf40   :  { %v2552_v23 = vpop.xlane.xlu0 %2551 }
 0xf41   :  { %v2556_v25 = vmul.f32 0.03125, %v2552_v23 }
 0xf43   :  { %v2558_v27 = vadd.f32 1e-05, %v2556_v25 }
 0xf44   :  { %v2555_v28 = vpop.xlane.xlu0 %2554 }
 0xf45   :  { %3114 = vrsqrt.f32 %v2558_v27  ;;  %v2557_v29 = vmul.f32 0.03125, %v2555_v28 }
 0xf47   :  { %v2559_v30 = vadd.f32 1e-05, %v2557_v29 }
 0xf49   :  { %3116 = vrsqrt.f32 %v2559_v30 }
 0xf52   :  { %v3115_v31 = vpop.eup %3114 }
 0xf53   :  { %v2562_v32 = vmul.f32 %v3115_v31, %v2546_v4 }
 0xf55   :  { %v2566_v33 = vadd.f32 %v2562_v32, %v3499_v44 }
 0xf56   :  { %v3117_v34 = vpop.eup %3116 }
 0xf57   :  { %v2568_v35 = vsel %vm52_vm1, %v2566_v33, 0.0  ;;  %v2563_v15 = vmul.f32 %v3117_v34, %v2547_v9 }
 0xf58   :  { %2569 = vadd.xlane.f32.xlu1 %v2568_v35 }
 0xf59   :  { %v2567_v36 = vadd.f32 %v2563_v15, %v3501_v62 }
 0xf5b   :  { %v2571_v37 = vsel %vm52_vm1, %v2567_v36, 0.0 }
 0xf5c   :  { %2572 = vadd.xlane.f32.xlu0 %v2571_v37 }
 0xfe1   :  { %v2570_v39 = vpop.xlane.xlu1 %2569 }
 0xfe2   :  { %v2574_v40 = vmul.f32 0.03125, %v2570_v39 }
 0xfe4   :  { %v2576_v41 = vsub.f32 %v2566_v33, %v2574_v40 }
 0xfe5   :  { %v2573_v43 = vpop.xlane.xlu0 %2572 }
 0xfe6   :  { %v2575_v45 = vmul.f32 0.03125, %v2573_v43  ;;  %v2578_v46 = vmul.f32 %v2576_v41, %v2576_v41 }
 0xfe8   :  { %v2577_v48 = vsub.f32 %v2567_v36, %v2575_v45  ;;  %v2580_v50 = vsel %vm52_vm1, %v2578_v46, 0.0 }
 0xfe9   :  { %2581 = vadd.xlane.f32.xlu0 %v2580_v50 }
 0xfea   :  { %v2579_v44 = vmul.f32 %v2577_v48, %v2577_v48 }
 0xfec   :  { %v2583_v1 = vsel %vm52_vm1, %v2579_v44, 0.0 }
 0xfed   :  { %2584 = vadd.xlane.f32.xlu0 %v2583_v1 }
0x1003   :  { %2594 = vrot.lane.b32.xlu0 %v3441_v13, %s3169_s5 }
0x1007   :  { %2599 = vrot.lane.b32.xlu0 %v3441_v13, %s3181_s25 }
0x1008   :  { %3133 = shalt.err (!%p3130_p4)
}
0x1009   :  { %s3185_s13 = smov 128   ;;  %s3186_s5 = smov [#allocation2]  }
0x100a   :  { %2629 = dma.vmem_to_hbm [thread:$0]  %s2624_s11, 256, %s3760_s7, [#allocation5], %s3185_s13, %s3185_s13, %s3179_s19  }
0x100b   :  { %s2611_s25 = sshll.u32 %s3186_s5, 4  ;;  %s2612_s25 = int_to_ptr.vmem [resolvable:$true] %s2611_s25 }
0x100c   :  { %s3142_s7 = scalar_lea.vmem %s2612_s25, 256  ;;  %p3147_p6 = scmp.lt.s32.totalorder %s2612_s25, %s2612_s25 }
0x100d   :  { %p3143_p5 = scmp.ne.s32.totalorder %s2612_s25, %s3142_s7  ;;  %p3148_p7 = scmp.lt.s32.totalorder %s3142_s7, %s3142_s7 }
0x100f   :  { %p3149_p8 = por %p3148_p7, %p3147_p6 }
0x1011   :  { %p3150_p9 = pnand %p3149_p8, %p3143_p5 }
0x1072   :  { %v2582_v62 = vpop.xlane.xlu0 %2581 }
0x1073   :  { %v2586_v13 = vmul.f32 0.03125, %v2582_v62 }
0x1075   :  { %v2588_v51 = vadd.f32 1e-05, %v2586_v13 }
0x1076   :  { %v2585_v52 = vpop.xlane.xlu0 %2584 }
0x1077   :  { %3118 = vrsqrt.f32 %v2588_v51  ;;  %v2587_v53 = vmul.f32 0.03125, %v2585_v52 }
0x1079   :  { %v2589_v54 = vadd.f32 1e-05, %v2587_v53 }
0x107a   :  { %v2595_v10 = vpop.permute.xlu0 %2594 }
0x107b   :  { %3120 = vrsqrt.f32 %v2589_v54 }
0x107e   :  { %v2600_v57 = vpop.permute.xlu0 %2599 }
0x1084   :  { %v3119_v55 = vpop.eup %3118 }
0x1085   :  { %v2592_v56 = vmul.f32 %v3119_v55, %v2576_v41 }
0x1087   :  { %v2597_v58 = vmul.f32 %v2595_v10, %v2592_v56 }
0x1088   :  { %v3121_v59 = vpop.eup %3120 }
0x1089   :  { %v2593_v38 = vmul.f32 %v3121_v59, %v2577_v48  ;;  %v2602_v60 = vadd.f32 %v2600_v57, %v2597_v58 }
0x108b   :  { %v2598_v61 = vmul.f32 %v2595_v10, %v2593_v38  ;;  %2604 = vst.msk [vmem:[#allocation2] sm:$0xff] %vm52_vm1, %v2602_v60 }
0x108d   :  { %v2603_v42 = vadd.f32 %v2600_v57, %v2598_v61 }
0x108f   :  { %2605 = vst.msk [vmem:[#allocation2 + $0x8] sm:$0xff] %vm52_vm1, %v2603_v42 }
0x1090   :  { %3153 = shalt.err (!%p3150_p9)
}
0x1091   :  { %2617 = dma.vmem_to_hbm [thread:$0]  %s2612_s25, 256, %s3759_s6, [#allocation3], %s3185_s13, %s3185_s13, %s3179_s19  }
0x1092   :  { %3162 = dma.done.wait [#allocation3], 256  }
0x1093   :  { %3163 = vsyncadd [#allocation3], 4294967040 }
0x1094   :  { %3164 = dma.done.wait [#allocation5], 256  }
0x1095   :  { %3165 = vsyncadd [#allocation5], 4294967040 }
0x1096   :  { %2636 = vsyncpa [#allocation3], 1 }
0x1097   :  { %2637 = vsyncpa [#allocation5], 1 }

</bundles_post_ra>
